<compile_context>
chip_gen: v7x
topology: tpu7x:2x2x1
jax: 0.10.0
libtpu: 0.0.40
codegen_flags: <defaults>
</compile_context>

<pallas_src>
import functools

import jax
import jax.numpy as jnp
from jax import lax
from jax.experimental import pallas as pl
from jax.experimental.pallas import tpu as pltpu


# ---------------------------------------------------------------------------
# Fused DP-step kernel:
#   out[i, j, h] = sigmoid( max_k  pf[i, k, h] + pr[k, j, h] )
#     pf[i, k, :] = f_in[i, k, :] @ W_fin (+ r[i, k, :] @ W_res) + bias
#     pr[k, j, :] = r[k, j, :] @ W_r
# Layouts inside the kernel (per batch element):
#   fin_ref : [T*T, Dfin]   rows (i, k)
#   rik_ref : [T*T, Dr]     rows (i, k)              (only when has_res)
#   rkj_ref : [T,   T*Dr]   rows k, cols (j, d)
#   wfin    : [Dfin, T*H]   = tile(W_fin, (1, T))    (j-tiled columns)
#   wres    : [Dr,   T*H]   = tile(W_res, (1, T))    (only when has_res)
#   wrbd    : [T*Dr, T*H]   = kron(I_T, W_r)         (block diagonal)
#   bias    : [1,    T*H]   = tile(b, (1, T))
#   o_ref   : [T,    T*H]   rows i, cols (j, h)
#   pf_sc   : VMEM [T*T, T*H] f32 scratch
# ---------------------------------------------------------------------------
def _dp_step_kernel(*refs, T, H, has_res):
    if has_res:
        (fin_ref, rik_ref, rkj_ref, wfin_ref, wres_ref, wrbd_ref,
         b_ref, o_ref, pf_sc) = refs
    else:
        fin_ref, rkj_ref, wfin_ref, wrbd_ref, b_ref, o_ref, pf_sc = refs
        rik_ref = wres_ref = None

    # Batched projections: one MXU call per operand per grid step.
    pf = jnp.dot(fin_ref[...], wfin_ref[...], preferred_element_type=jnp.float32)
    if has_res:
        pf = pf + jnp.dot(rik_ref[...], wres_ref[...],
                          preferred_element_type=jnp.float32)
    pf_sc[...] = pf + b_ref[...]          # bias folded into pf only (exact)
    pr = jnp.dot(rkj_ref[...], wrbd_ref[...],
                 preferred_element_type=jnp.float32)      # [T, T*H], rows k

    def one_row(i):
        # slab s[k, (j,h)] = pf[i,k,h] + pr[k,j,h]; max over k is a cross-sublane
        # (XLU) reduce -> no serial VPU dependency chain over k.
        s = pf_sc[pl.ds(i * T, T), :] + pr
        row = jnp.max(s, axis=0, keepdims=True)
        # sigmoid hoisted past the max (monotone -> exact); bf16 on store.
        o_ref[pl.ds(i, 1), :] = jax.nn.sigmoid(row).astype(o_ref.dtype)

    if T <= 32:
        # Small T: static unroll -> static slices / stores, best scheduling.
        for i in range(T):
            one_row(i)
    else:
        # Larger T: rolled loop to bound code size and vreg live ranges.
        def body(i, carry):
            one_row(i)
            return carry
        lax.fori_loop(0, T, body, 0, unroll=False)


def dp_step(f_ik, r_ik, r_kj, W_fin, W_res, W_r, b, *, T, H):
    """One fused DP step.

    f_ik : [B, T*T, Dfin] bf16, rows (i, k)   (previous step output, or r at step 0)
    r_ik : [B, T*T, Dr]   bf16, rows (i, k)   (relation tensor, flat view)
    r_kj : [B, T,   T*Dr] bf16, rows k, cols (j, d)   (same bytes, packed view)
    W_fin: [Dfin, H], W_res: [Dr, H] or None, W_r: [Dr, H], b: [H]
    returns [B, T, T*H] bf16 with element (b, i, j*H + h).
    """
    B = f_ik.shape[0]
    Dfin = f_ik.shape[-1]
    Dr = W_r.shape[0]
    TH = T * H
    has_res = W_res is not None
    bf = jnp.bfloat16

    # j-tiled / block-diagonal weights: both projections become one matmul each
    # and land directly in the (j, h)-packed lane layout.
    wfin_t = jnp.tile(W_fin.astype(bf), (1, T))                         # [Dfin, T*H]
    wrbd = jnp.kron(jnp.eye(T, dtype=jnp.float32),
                    W_r.astype(jnp.float32)).astype(bf)                 # [T*Dr, T*H]
    b_t = jnp.tile(b.reshape(1, H).astype(jnp.float32), (1, T))         # [1, T*H]

    operands = [f_ik.astype(bf)]
    in_specs = [pl.BlockSpec((None, T * T, Dfin), lambda bi: (bi, 0, 0))]
    if has_res:
        wres_t = jnp.tile(W_res.astype(bf), (1, T))                     # [Dr, T*H]
        operands.append(r_ik.astype(bf))
        in_specs.append(pl.BlockSpec((None, T * T, Dr), lambda bi: (bi, 0, 0)))
    operands.append(r_kj.astype(bf))
    in_specs.append(pl.BlockSpec((None, T, T * Dr), lambda bi: (bi, 0, 0)))
    operands.append(wfin_t)
    in_specs.append(pl.BlockSpec((Dfin, TH), lambda bi: (0, 0)))
    if has_res:
        operands.append(wres_t)
        in_specs.append(pl.BlockSpec((Dr, TH), lambda bi: (0, 0)))
    operands.append(wrbd)
    in_specs.append(pl.BlockSpec((T * Dr, TH), lambda bi: (0, 0)))
    operands.append(b_t)
    in_specs.append(pl.BlockSpec((1, TH), lambda bi: (0, 0)))

    # Explicit VMEM budget (input/output blocks are double-buffered).
    blk = (T * T * Dfin * 2 + (T * T * Dr * 2 if has_res else 0)
           + T * T * Dr * 2 + Dfin * TH * 2 + (Dr * TH * 2 if has_res else 0)
           + T * Dr * TH * 2 + TH * 4 + T * TH * 2)
    scratch = T * T * TH * 4
    vmem_limit = int(min(64 * 2 ** 20, max(16 * 2 ** 20, 4 * (2 * blk + scratch))))

    return pl.pallas_call(
        functools.partial(_dp_step_kernel, T=T, H=H, has_res=has_res),
        out_shape=jax.ShapeDtypeStruct((B, T, TH), jnp.bfloat16),
        grid_spec=pltpu.PrefetchScalarGridSpec(
            num_scalar_prefetch=0,
            grid=(B,),
            in_specs=in_specs,
            out_specs=pl.BlockSpec((None, T, TH), lambda bi: (bi, 0, 0)),
            scratch_shapes=[pltpu.VMEM((T * T, TH), jnp.float32)],
        ),
        compiler_params=pltpu.CompilerParams(
            dimension_semantics=("parallel",),
            vmem_limit_bytes=vmem_limit),
    )(*operands)


# ---------------------------------------------------------------------------
# Final MLPLogic projection: sigmoid(sum_p xs[p] @ Ws[p] + b), row-tiled,
# output columns zero-padded up to a multiple of 128 (lane-dense stores).
# ---------------------------------------------------------------------------
def _linear_sigmoid_kernel(*refs, n_parts):
    xs = refs[:n_parts]
    ws = refs[n_parts:2 * n_parts]
    b_ref = refs[2 * n_parts]
    o_ref = refs[2 * n_parts + 1]
    acc = jnp.dot(xs[0][...], ws[0][...], preferred_element_type=jnp.float32)
    for p in range(1, n_parts):
        acc = acc + jnp.dot(xs[p][...], ws[p][...],
                            preferred_element_type=jnp.float32)
    o_ref[...] = jax.nn.sigmoid(acc + b_ref[...]).astype(o_ref.dtype)


def pallas_linear_sigmoid(xs, Ws, b, *, row_tile=512):
    """sigmoid(sum_p xs[p] @ Ws[p] + b) -> [M, Dout] f32 (row-major, no transposes)."""
    M = xs[0].shape[0]
    Dout = Ws[0].shape[1]
    Dp = 128 * ((Dout + 127) // 128)
    rt = int(min(row_tile, 8 * ((M + 7) // 8)))
    n_tiles = (M + rt - 1) // rt
    Mp = n_tiles * rt

    xs_p, x_specs, w_specs = [], [], []
    for x in xs:
        x = x.astype(jnp.bfloat16)
        if Mp != M:
            # Padded rows produce sigmoid(b); they are sliced off below.
            x = jnp.pad(x, ((0, Mp - M), (0, 0)))
        xs_p.append(x)
        x_specs.append(pl.BlockSpec((rt, x.shape[1]), lambda m: (m, 0)))
    Ws_p = []
    for W in Ws:
        Wp = jnp.pad(W.astype(jnp.bfloat16), ((0, 0), (0, Dp - Dout)))
        Ws_p.append(Wp)
        w_specs.append(pl.BlockSpec((Wp.shape[0], Dp), lambda m: (0, 0)))
    b_p = jnp.pad(b.astype(jnp.float32).reshape(1, Dout), ((0, 0), (0, Dp - Dout)))

    out = pl.pallas_call(
        functools.partial(_linear_sigmoid_kernel, n_parts=len(xs)),
        out_shape=jax.ShapeDtypeStruct((Mp, Dp), jnp.float32),
        grid_spec=pltpu.PrefetchScalarGridSpec(
            num_scalar_prefetch=0,
            grid=(n_tiles,),
            in_specs=x_specs + w_specs + [pl.BlockSpec((1, Dp), lambda m: (0, 0))],
            out_specs=pl.BlockSpec((rt, Dp), lambda m: (m, 0)),
        ),
        compiler_params=pltpu.CompilerParams(
            dimension_semantics=("parallel",)),
    )(*xs_p, *Ws_p, b_p)
    return out[:M, :Dout]


# ---------------------------------------------------------------------------
# Glue (plain JAX): interval pooling (prefix scans), param init, orchestration
# ---------------------------------------------------------------------------
def interval_pooling(a, reduction):
    # TODO(synk): source of `interval_pooling` not provided with the module; assumed
    # semantics: out[b, i, j, :] = reduce_{k in [min(i,j), max(i,j)]} a[b, i, k, :].
    # Implemented with O(t^2 * D) prefix cummax/cummin scans (XLA glue).
    B, t, _, D = a.shape
    i_idx = jnp.arange(t)[None, :, None, None]
    k_idx = jnp.arange(t)[None, None, :, None]
    a = a.astype(jnp.float32)
    if reduction == "max":
        neutral, cum = -jnp.inf, lax.cummax
    else:
        neutral, cum = jnp.inf, lax.cummin
    upper = cum(jnp.where(k_idx >= i_idx, a, neutral), axis=2)                # j >= i
    lower = cum(jnp.where(k_idx <= i_idx, a, neutral), axis=2, reverse=True)  # j <= i
    return jnp.where(k_idx >= i_idx, upper, lower)


def init_params(key, input_dim, output_dim, nr_steps, hidden_dims,
                residual_input=True, until=True):
    # TODO(synk): MLPLogic(in, out, []) assumed to be a single Linear + Sigmoid.
    relation_dim = input_dim * (2 if until else 1)
    dims = []
    current = relation_dim
    for i in range(nr_steps - 1):
        dims.append((current + relation_dim, hidden_dims[i]))
        current = hidden_dims[i] + (relation_dim if residual_input else 0)
    dims.append((current, output_dim))
    params = []
    for din, dout in dims:
        key, kw, kb = jax.random.split(key, 3)
        W = jax.random.normal(kw, (din, dout), jnp.float32) * 0.2
        b = jax.random.normal(kb, (dout,), jnp.float32) * 0.1
        params.append((W, b))
    return params


def tlm_dp2d_forward(a, params, *, nr_steps, residual_input=True, until=True):
    """a: [batch, t, t, input_dim] -> [batch, t, t, output_dim]."""
    B, t, _, _ = a.shape
    T = t + 1
    if until:
        r4 = jnp.concatenate(
            [interval_pooling(a, "max"), interval_pooling(a, "min")], axis=-1)
    else:
        r4 = interval_pooling(a, "max")
    Dr = r4.shape[-1]
    # Reference padding: f = zeros(B, T, T, Dr); f[:, :-1, 1:] = r; r = f
    r_pad = jnp.zeros((B, T, T, Dr), jnp.float32).at[:, :-1, 1:].set(r4)
    r_bf = r_pad.astype(jnp.bfloat16)            # cast once (bf16 MXU operands)
    r_ik = r_bf.reshape(B, T * T, Dr)            # rows (i, k)         -- free reshape
    r_kj = r_bf.reshape(B, T, T * Dr)            # rows k, cols (j, d) -- free reshape

    f_ik = r_ik
    Dfin = Dr
    for step in range(nr_steps - 1):
        W, b = params[step]
        H = W.shape[1]
        if step == 0:
            # f == r at step 0: the whole "f" half of the weight applies to r(i, k).
            W_fin, W_res, W_r = W[:Dr], None, W[Dr:]
        elif residual_input:
            W_fin, W_res, W_r = W[:Dfin], W[Dfin:Dfin + Dr], W[Dfin + Dr:]
        else:
            W_fin, W_res, W_r = W[:Dfin], None, W[Dfin:]
        # TODO(synk): `transition_pooling_2d1d` assumed to be max over the middle
        # time index (max-plus composition over k).
        out_step = dp_step(f_ik, r_ik, r_kj, W_fin, W_res, W_r, b, T=T, H=H)
        f_ik = out_step.reshape(B, T * T, H)     # rows (i, j)         -- free reshape
        Dfin = H

    W, b = params[-1]
    if nr_steps >= 2 and residual_input:
        out2d = pallas_linear_sigmoid(
            [f_ik.reshape(B * T * T, Dfin), r_ik.reshape(B * T * T, Dr)],
            [W[:Dfin], W[Dfin:]], b)
    else:
        out2d = pallas_linear_sigmoid([f_ik.reshape(B * T * T, Dfin)], [W], b)
    out = out2d.reshape(B, T, T, -1)
    return out[:, :-1, 1:]


# ---------------------------------------------------------------------------
# Pure-JAX f32 reference of the same assumed semantics (for a sanity check)
# ---------------------------------------------------------------------------
def _reference_forward(a, params, *, nr_steps, residual_input=True, until=True):
    B, t, _, _ = a.shape
    T = t + 1
    if until:
        r4 = jnp.concatenate(
            [interval_pooling(a, "max"), interval_pooling(a, "min")], axis=-1)
    else:
        r4 = interval_pooling(a, "max")
    Dr = r4.shape[-1]
    f = jnp.zeros((B, T, T, Dr), jnp.float32).at[:, :-1, 1:].set(r4)
    r = f
    for step in range(nr_steps - 1):
        W, b = params[step]
        lin_in = jnp.concatenate([
            jnp.broadcast_to(f[:, :, :, None, :], (B, T, T, T, f.shape[-1])),
            jnp.broadcast_to(r[:, None, :, :, :], (B, T, T, T, Dr)),
        ], axis=-1)
        y = jax.nn.sigmoid(jnp.einsum('biktd,dh->bikth', lin_in, W) + b)
        f = jnp.max(y, axis=2)                                   # max over k
        if residual_input:
            f = jnp.concatenate([f, r], axis=-1)
    W, b = params[-1]
    out = jax.nn.sigmoid(jnp.einsum('bijd,dh->bijh', f, W) + b)
    return out[:, :-1, 1:]


# ---------------------------------------------------------------------------
if __name__ == "__main__":
    key = jax.random.PRNGKey(0)
    B, t = 2, 8
    input_dim, output_dim, nr_steps = 4, 4, 3
    hidden_dims = [4, 4]
    until, residual_input = True, True

    k_a, k_p = jax.random.split(key)
    a = jax.random.uniform(k_a, (B, t, t, input_dim), dtype=jnp.float32)
    params = init_params(k_p, input_dim, output_dim, nr_steps, hidden_dims,
                         residual_input=residual_input, until=until)

    fwd = jax.jit(functools.partial(
        tlm_dp2d_forward, nr_steps=nr_steps,
        residual_input=residual_input, until=until))
    out = jax.block_until_ready(fwd(a, params))

    assert out.shape == (B, t, t, output_dim), out.shape
    assert bool(jnp.all(jnp.isfinite(out)))

    # Cross-check against a pure-JAX f32 reference of the same assumed semantics
    # (bf16 MXU operands / bf16 inter-step activations -> loose tolerance).
    ref = _reference_forward(a, params, nr_steps=nr_steps,
                             residual_input=residual_input, until=until)
    err = float(jnp.max(jnp.abs(out - ref)))
    assert err < 5e-2, err

    print("KERNEL_OK")
</pallas_src>

<mosaic_0001>
module attributes {stable_mosaic.version = 11 : i64} {
  func.func @_dp_step_kernel(%arg0: i32, %arg1: memref<1x81x4xbf16, #tpu.memory_space<vmem>>, %arg2: memref<1x81x8xbf16, #tpu.memory_space<vmem>>, %arg3: memref<1x9x72xbf16, #tpu.memory_space<vmem>>, %arg4: memref<4x36xbf16, #tpu.memory_space<vmem>>, %arg5: memref<8x36xbf16, #tpu.memory_space<vmem>>, %arg6: memref<72x36xbf16, #tpu.memory_space<vmem>>, %arg7: memref<1x36xf32, #tpu.memory_space<vmem>>, %arg8: memref<1x9x36xbf16, #tpu.memory_space<vmem>>, %arg9: memref<81x36xf32, #tpu.memory_space<vmem>>) attributes {dimension_semantics = [#tpu.dimension_semantics<parallel>], iteration_bounds = array<i64: 2>, scalar_prefetch = 0 : i64, scratch_operands = 1 : i64, tpu.core_type = #tpu.core_type<tc>, window_params = [{transform_indices = @transform_0, window_bounds = array<i64: 1, 81, 4>}, {transform_indices = @transform_1, window_bounds = array<i64: 1, 81, 8>}, {transform_indices = @transform_2, window_bounds = array<i64: 1, 9, 72>}, {pipeline_mode = #tpu.pipeline_mode<synchronous>, transform_indices = @transform_3, window_bounds = array<i64: 4, 36>}, {pipeline_mode = #tpu.pipeline_mode<synchronous>, transform_indices = @transform_4, window_bounds = array<i64: 8, 36>}, {pipeline_mode = #tpu.pipeline_mode<synchronous>, transform_indices = @transform_5, window_bounds = array<i64: 72, 36>}, {pipeline_mode = #tpu.pipeline_mode<synchronous>, transform_indices = @transform_6, window_bounds = array<i64: 1, 36>}, {transform_indices = @transform_7, window_bounds = array<i64: 1, 9, 36>}]} {
    %c0 = arith.constant 0 : index
    %c0_0 = arith.constant 0 : index
    %c0_1 = arith.constant 0 : index
    %0 = vector.load %arg1[%c0, %c0_0, %c0_1] : memref<1x81x4xbf16, #tpu.memory_space<vmem>>, vector<1x81x4xbf16>
    %1 = vector.shape_cast %0 : vector<1x81x4xbf16> to vector<81x4xbf16>
    %c0_2 = arith.constant 0 : index
    %c0_3 = arith.constant 0 : index
    %2 = vector.load %arg4[%c0_2, %c0_3] : memref<4x36xbf16, #tpu.memory_space<vmem>>, vector<4x36xbf16>
    %cst = arith.constant dense<0.000000e+00> : vector<81x36xf32>
    %3 = tpu.matmul %1, %2, %cst {dimension_numbers = #tpu.dot_dimension_numbers<[1], [0], [0], [1], [0, 0, 1, 1], [], []>} : vector<81x4xbf16>, vector<4x36xbf16>, vector<81x36xf32> -> vector<81x36xf32>
    %c0_4 = arith.constant 0 : index
    %c0_5 = arith.constant 0 : index
    %c0_6 = arith.constant 0 : index
    %4 = vector.load %arg2[%c0_4, %c0_5, %c0_6] : memref<1x81x8xbf16, #tpu.memory_space<vmem>>, vector<1x81x8xbf16>
    %5 = vector.shape_cast %4 : vector<1x81x8xbf16> to vector<81x8xbf16>
    %c0_7 = arith.constant 0 : index
    %c0_8 = arith.constant 0 : index
    %6 = vector.load %arg5[%c0_7, %c0_8] : memref<8x36xbf16, #tpu.memory_space<vmem>>, vector<8x36xbf16>
    %cst_9 = arith.constant dense<0.000000e+00> : vector<81x36xf32>
    %7 = tpu.matmul %5, %6, %cst_9 {dimension_numbers = #tpu.dot_dimension_numbers<[1], [0], [0], [1], [0, 0, 1, 1], [], []>} : vector<81x8xbf16>, vector<8x36xbf16>, vector<81x36xf32> -> vector<81x36xf32>
    %8 = arith.addf %3, %7 : vector<81x36xf32>
    %c0_10 = arith.constant 0 : index
    %c0_11 = arith.constant 0 : index
    %9 = vector.load %arg7[%c0_10, %c0_11] : memref<1x36xf32, #tpu.memory_space<vmem>>, vector<1x36xf32>
    %10 = vector.broadcast %9 : vector<1x36xf32> to vector<81x36xf32>
    %11 = arith.addf %8, %10 : vector<81x36xf32>
    %c0_12 = arith.constant 0 : index
    %c0_13 = arith.constant 0 : index
    %12 = vector.load %arg9[%c0_12, %c0_13] : memref<81x36xf32, #tpu.memory_space<vmem>>, vector<81x36xf32>
    tpu.vector_store %arg9[%c0_12, %c0_13], %11 {strides = array<i32>} : memref<81x36xf32, #tpu.memory_space<vmem>>, vector<81x36xf32>,
    %c0_14 = arith.constant 0 : index
    %c0_15 = arith.constant 0 : index
    %c0_16 = arith.constant 0 : index
    %13 = vector.load %arg3[%c0_14, %c0_15, %c0_16] : memref<1x9x72xbf16, #tpu.memory_space<vmem>>, vector<1x9x72xbf16>
    %14 = vector.shape_cast %13 : vector<1x9x72xbf16> to vector<9x72xbf16>
    %c0_17 = arith.constant 0 : index
    %c0_18 = arith.constant 0 : index
    %15 = vector.load %arg6[%c0_17, %c0_18] : memref<72x36xbf16, #tpu.memory_space<vmem>>, vector<72x36xbf16>
    %cst_19 = arith.constant dense<0.000000e+00> : vector<9x36xf32>
    %16 = tpu.matmul %14, %15, %cst_19 {dimension_numbers = #tpu.dot_dimension_numbers<[1], [0], [0], [1], [0, 0, 1, 1], [], []>} : vector<9x72xbf16>, vector<72x36xbf16>, vector<9x36xf32> -> vector<9x36xf32>
    %c0_20 = arith.constant 0 : index
    %c0_21 = arith.constant 0 : index
    %17 = vector.load %arg9[%c0_20, %c0_21] : memref<81x36xf32, #tpu.memory_space<vmem>>, vector<9x36xf32>
    %18 = arith.addf %17, %16 : vector<9x36xf32>
    %cst_22 = arith.constant dense<0xFF800000> : vector<36xf32>
    %19 = vector.multi_reduction <maximumf>, %18, %cst_22 [0] : vector<9x36xf32> to vector<36xf32>
    %20 = vector.shape_cast %19 : vector<36xf32> to vector<1x36xf32>
    %21 = arith.negf %20 : vector<1x36xf32>
    %22 = math.exp %21 : vector<1x36xf32>
    %cst_23 = arith.constant 1.000000e+00 : f32
    %23 = vector.broadcast %cst_23 : f32 to vector<1x36xf32>
    %24 = arith.addf %23, %22 : vector<1x36xf32>
    %25 = arith.divf %23, %24 : vector<1x36xf32>
    %26 = arith.truncf %25 : vector<1x36xf32> to vector<1x36xbf16>
    %c0_24 = arith.constant 0 : index
    %c0_25 = arith.constant 0 : index
    %c0_26 = arith.constant 0 : index
    %27 = vector.load %arg8[%c0_24, %c0_25, %c0_26] : memref<1x9x36xbf16, #tpu.memory_space<vmem>>, vector<1x1x36xbf16>
    %28 = vector.shape_cast %27 : vector<1x1x36xbf16> to vector<1x36xbf16>
    %29 = vector.shape_cast %26 : vector<1x36xbf16> to vector<1x1x36xbf16>
    tpu.vector_store %arg8[%c0_24, %c0_25, %c0_26], %29 {strides = array<i32>} : memref<1x9x36xbf16, #tpu.memory_space<vmem>>, vector<1x1x36xbf16>,
    %c9 = arith.constant 9 : index
    %c0_27 = arith.constant 0 : index
    %30 = vector.load %arg9[%c9, %c0_27] : memref<81x36xf32, #tpu.memory_space<vmem>>, vector<9x36xf32>
    %31 = arith.addf %30, %16 : vector<9x36xf32>
    %cst_28 = arith.constant dense<0xFF800000> : vector<36xf32>
    %32 = vector.multi_reduction <maximumf>, %31, %cst_28 [0] : vector<9x36xf32> to vector<36xf32>
    %33 = vector.shape_cast %32 : vector<36xf32> to vector<1x36xf32>
    %34 = arith.negf %33 : vector<1x36xf32>
    %35 = math.exp %34 : vector<1x36xf32>
    %cst_29 = arith.constant 1.000000e+00 : f32
    %36 = vector.broadcast %cst_29 : f32 to vector<1x36xf32>
    %37 = arith.addf %36, %35 : vector<1x36xf32>
    %38 = arith.divf %36, %37 : vector<1x36xf32>
    %39 = arith.truncf %38 : vector<1x36xf32> to vector<1x36xbf16>
    %c0_30 = arith.constant 0 : index
    %c1 = arith.constant 1 : index
    %c0_31 = arith.constant 0 : index
    %40 = vector.load %arg8[%c0_30, %c1, %c0_31] : memref<1x9x36xbf16, #tpu.memory_space<vmem>>, vector<1x1x36xbf16>
    %41 = vector.shape_cast %40 : vector<1x1x36xbf16> to vector<1x36xbf16>
    %42 = vector.shape_cast %39 : vector<1x36xbf16> to vector<1x1x36xbf16>
    tpu.vector_store %arg8[%c0_30, %c1, %c0_31], %42 {strides = array<i32>} : memref<1x9x36xbf16, #tpu.memory_space<vmem>>, vector<1x1x36xbf16>,
    %c18 = arith.constant 18 : index
    %c0_32 = arith.constant 0 : index
    %43 = vector.load %arg9[%c18, %c0_32] : memref<81x36xf32, #tpu.memory_space<vmem>>, vector<9x36xf32>
    %44 = arith.addf %43, %16 : vector<9x36xf32>
    %cst_33 = arith.constant dense<0xFF800000> : vector<36xf32>
    %45 = vector.multi_reduction <maximumf>, %44, %cst_33 [0] : vector<9x36xf32> to vector<36xf32>
    %46 = vector.shape_cast %45 : vector<36xf32> to vector<1x36xf32>
    %47 = arith.negf %46 : vector<1x36xf32>
    %48 = math.exp %47 : vector<1x36xf32>
    %cst_34 = arith.constant 1.000000e+00 : f32
    %49 = vector.broadcast %cst_34 : f32 to vector<1x36xf32>
    %50 = arith.addf %49, %48 : vector<1x36xf32>
    %51 = arith.divf %49, %50 : vector<1x36xf32>
    %52 = arith.truncf %51 : vector<1x36xf32> to vector<1x36xbf16>
    %c0_35 = arith.constant 0 : index
    %c2 = arith.constant 2 : index
    %c0_36 = arith.constant 0 : index
    %53 = vector.load %arg8[%c0_35, %c2, %c0_36] : memref<1x9x36xbf16, #tpu.memory_space<vmem>>, vector<1x1x36xbf16>
    %54 = vector.shape_cast %53 : vector<1x1x36xbf16> to vector<1x36xbf16>
    %55 = vector.shape_cast %52 : vector<1x36xbf16> to vector<1x1x36xbf16>
    tpu.vector_store %arg8[%c0_35, %c2, %c0_36], %55 {strides = array<i32>} : memref<1x9x36xbf16, #tpu.memory_space<vmem>>, vector<1x1x36xbf16>,
    %c27 = arith.constant 27 : index
    %c0_37 = arith.constant 0 : index
    %56 = vector.load %arg9[%c27, %c0_37] : memref<81x36xf32, #tpu.memory_space<vmem>>, vector<9x36xf32>
    %57 = arith.addf %56, %16 : vector<9x36xf32>
    %cst_38 = arith.constant dense<0xFF800000> : vector<36xf32>
    %58 = vector.multi_reduction <maximumf>, %57, %cst_38 [0] : vector<9x36xf32> to vector<36xf32>
    %59 = vector.shape_cast %58 : vector<36xf32> to vector<1x36xf32>
    %60 = arith.negf %59 : vector<1x36xf32>
    %61 = math.exp %60 : vector<1x36xf32>
    %cst_39 = arith.constant 1.000000e+00 : f32
    %62 = vector.broadcast %cst_39 : f32 to vector<1x36xf32>
    %63 = arith.addf %62, %61 : vector<1x36xf32>
    %64 = arith.divf %62, %63 : vector<1x36xf32>
    %65 = arith.truncf %64 : vector<1x36xf32> to vector<1x36xbf16>
    %c0_40 = arith.constant 0 : index
    %c3 = arith.constant 3 : index
    %c0_41 = arith.constant 0 : index
    %66 = vector.load %arg8[%c0_40, %c3, %c0_41] : memref<1x9x36xbf16, #tpu.memory_space<vmem>>, vector<1x1x36xbf16>
    %67 = vector.shape_cast %66 : vector<1x1x36xbf16> to vector<1x36xbf16>
    %68 = vector.shape_cast %65 : vector<1x36xbf16> to vector<1x1x36xbf16>
    tpu.vector_store %arg8[%c0_40, %c3, %c0_41], %68 {strides = array<i32>} : memref<1x9x36xbf16, #tpu.memory_space<vmem>>, vector<1x1x36xbf16>,
    %c36 = arith.constant 36 : index
    %c0_42 = arith.constant 0 : index
    %69 = vector.load %arg9[%c36, %c0_42] : memref<81x36xf32, #tpu.memory_space<vmem>>, vector<9x36xf32>
    %70 = arith.addf %69, %16 : vector<9x36xf32>
    %cst_43 = arith.constant dense<0xFF800000> : vector<36xf32>
    %71 = vector.multi_reduction <maximumf>, %70, %cst_43 [0] : vector<9x36xf32> to vector<36xf32>
    %72 = vector.shape_cast %71 : vector<36xf32> to vector<1x36xf32>
    %73 = arith.negf %72 : vector<1x36xf32>
    %74 = math.exp %73 : vector<1x36xf32>
    %cst_44 = arith.constant 1.000000e+00 : f32
    %75 = vector.broadcast %cst_44 : f32 to vector<1x36xf32>
    %76 = arith.addf %75, %74 : vector<1x36xf32>
    %77 = arith.divf %75, %76 : vector<1x36xf32>
    %78 = arith.truncf %77 : vector<1x36xf32> to vector<1x36xbf16>
    %c0_45 = arith.constant 0 : index
    %c4 = arith.constant 4 : index
    %c0_46 = arith.constant 0 : index
    %79 = vector.load %arg8[%c0_45, %c4, %c0_46] : memref<1x9x36xbf16, #tpu.memory_space<vmem>>, vector<1x1x36xbf16>
    %80 = vector.shape_cast %79 : vector<1x1x36xbf16> to vector<1x36xbf16>
    %81 = vector.shape_cast %78 : vector<1x36xbf16> to vector<1x1x36xbf16>
    tpu.vector_store %arg8[%c0_45, %c4, %c0_46], %81 {strides = array<i32>} : memref<1x9x36xbf16, #tpu.memory_space<vmem>>, vector<1x1x36xbf16>,
    %c45 = arith.constant 45 : index
    %c0_47 = arith.constant 0 : index
    %82 = vector.load %arg9[%c45, %c0_47] : memref<81x36xf32, #tpu.memory_space<vmem>>, vector<9x36xf32>
    %83 = arith.addf %82, %16 : vector<9x36xf32>
    %cst_48 = arith.constant dense<0xFF800000> : vector<36xf32>
    %84 = vector.multi_reduction <maximumf>, %83, %cst_48 [0] : vector<9x36xf32> to vector<36xf32>
    %85 = vector.shape_cast %84 : vector<36xf32> to vector<1x36xf32>
    %86 = arith.negf %85 : vector<1x36xf32>
    %87 = math.exp %86 : vector<1x36xf32>
    %cst_49 = arith.constant 1.000000e+00 : f32
    %88 = vector.broadcast %cst_49 : f32 to vector<1x36xf32>
    %89 = arith.addf %88, %87 : vector<1x36xf32>
    %90 = arith.divf %88, %89 : vector<1x36xf32>
    %91 = arith.truncf %90 : vector<1x36xf32> to vector<1x36xbf16>
    %c0_50 = arith.constant 0 : index
    %c5 = arith.constant 5 : index
    %c0_51 = arith.constant 0 : index
    %92 = vector.load %arg8[%c0_50, %c5, %c0_51] : memref<1x9x36xbf16, #tpu.memory_space<vmem>>, vector<1x1x36xbf16>
    %93 = vector.shape_cast %92 : vector<1x1x36xbf16> to vector<1x36xbf16>
    %94 = vector.shape_cast %91 : vector<1x36xbf16> to vector<1x1x36xbf16>
    tpu.vector_store %arg8[%c0_50, %c5, %c0_51], %94 {strides = array<i32>} : memref<1x9x36xbf16, #tpu.memory_space<vmem>>, vector<1x1x36xbf16>,
    %c54 = arith.constant 54 : index
    %c0_52 = arith.constant 0 : index
    %95 = vector.load %arg9[%c54, %c0_52] : memref<81x36xf32, #tpu.memory_space<vmem>>, vector<9x36xf32>
    %96 = arith.addf %95, %16 : vector<9x36xf32>
    %cst_53 = arith.constant dense<0xFF800000> : vector<36xf32>
    %97 = vector.multi_reduction <maximumf>, %96, %cst_53 [0] : vector<9x36xf32> to vector<36xf32>
    %98 = vector.shape_cast %97 : vector<36xf32> to vector<1x36xf32>
    %99 = arith.negf %98 : vector<1x36xf32>
    %100 = math.exp %99 : vector<1x36xf32>
    %cst_54 = arith.constant 1.000000e+00 : f32
    %101 = vector.broadcast %cst_54 : f32 to vector<1x36xf32>
    %102 = arith.addf %101, %100 : vector<1x36xf32>
    %103 = arith.divf %101, %102 : vector<1x36xf32>
    %104 = arith.truncf %103 : vector<1x36xf32> to vector<1x36xbf16>
    %c0_55 = arith.constant 0 : index
    %c6 = arith.constant 6 : index
    %c0_56 = arith.constant 0 : index
    %105 = vector.load %arg8[%c0_55, %c6, %c0_56] : memref<1x9x36xbf16, #tpu.memory_space<vmem>>, vector<1x1x36xbf16>
    %106 = vector.shape_cast %105 : vector<1x1x36xbf16> to vector<1x36xbf16>
    %107 = vector.shape_cast %104 : vector<1x36xbf16> to vector<1x1x36xbf16>
    tpu.vector_store %arg8[%c0_55, %c6, %c0_56], %107 {strides = array<i32>} : memref<1x9x36xbf16, #tpu.memory_space<vmem>>, vector<1x1x36xbf16>,
    %c63 = arith.constant 63 : index
    %c0_57 = arith.constant 0 : index
    %108 = vector.load %arg9[%c63, %c0_57] : memref<81x36xf32, #tpu.memory_space<vmem>>, vector<9x36xf32>
    %109 = arith.addf %108, %16 : vector<9x36xf32>
    %cst_58 = arith.constant dense<0xFF800000> : vector<36xf32>
    %110 = vector.multi_reduction <maximumf>, %109, %cst_58 [0] : vector<9x36xf32> to vector<36xf32>
    %111 = vector.shape_cast %110 : vector<36xf32> to vector<1x36xf32>
    %112 = arith.negf %111 : vector<1x36xf32>
    %113 = math.exp %112 : vector<1x36xf32>
    %cst_59 = arith.constant 1.000000e+00 : f32
    %114 = vector.broadcast %cst_59 : f32 to vector<1x36xf32>
    %115 = arith.addf %114, %113 : vector<1x36xf32>
    %116 = arith.divf %114, %115 : vector<1x36xf32>
    %117 = arith.truncf %116 : vector<1x36xf32> to vector<1x36xbf16>
    %c0_60 = arith.constant 0 : index
    %c7 = arith.constant 7 : index
    %c0_61 = arith.constant 0 : index
    %118 = vector.load %arg8[%c0_60, %c7, %c0_61] : memref<1x9x36xbf16, #tpu.memory_space<vmem>>, vector<1x1x36xbf16>
    %119 = vector.shape_cast %118 : vector<1x1x36xbf16> to vector<1x36xbf16>
    %120 = vector.shape_cast %117 : vector<1x36xbf16> to vector<1x1x36xbf16>
    tpu.vector_store %arg8[%c0_60, %c7, %c0_61], %120 {strides = array<i32>} : memref<1x9x36xbf16, #tpu.memory_space<vmem>>, vector<1x1x36xbf16>,
    %c72 = arith.constant 72 : index
    %c0_62 = arith.constant 0 : index
    %121 = vector.load %arg9[%c72, %c0_62] : memref<81x36xf32, #tpu.memory_space<vmem>>, vector<9x36xf32>
    %122 = arith.addf %121, %16 : vector<9x36xf32>
    %cst_63 = arith.constant dense<0xFF800000> : vector<36xf32>
    %123 = vector.multi_reduction <maximumf>, %122, %cst_63 [0] : vector<9x36xf32> to vector<36xf32>
    %124 = vector.shape_cast %123 : vector<36xf32> to vector<1x36xf32>
    %125 = arith.negf %124 : vector<1x36xf32>
    %126 = math.exp %125 : vector<1x36xf32>
    %cst_64 = arith.constant 1.000000e+00 : f32
    %127 = vector.broadcast %cst_64 : f32 to vector<1x36xf32>
    %128 = arith.addf %127, %126 : vector<1x36xf32>
    %129 = arith.divf %127, %128 : vector<1x36xf32>
    %130 = arith.truncf %129 : vector<1x36xf32> to vector<1x36xbf16>
    %c0_65 = arith.constant 0 : index
    %c8 = arith.constant 8 : index
    %c0_66 = arith.constant 0 : index
    %131 = vector.load %arg8[%c0_65, %c8, %c0_66] : memref<1x9x36xbf16, #tpu.memory_space<vmem>>, vector<1x1x36xbf16>
    %132 = vector.shape_cast %131 : vector<1x1x36xbf16> to vector<1x36xbf16>
    %133 = vector.shape_cast %130 : vector<1x36xbf16> to vector<1x1x36xbf16>
    tpu.vector_store %arg8[%c0_65, %c8, %c0_66], %133 {strides = array<i32>} : memref<1x9x36xbf16, #tpu.memory_space<vmem>>, vector<1x1x36xbf16>,
    return
  }
  func.func @transform_0(%arg0: i32) -> (i32, i32, i32) {
    %c0_i32 = arith.constant 0 : i32
    %c0_i32_0 = arith.constant 0 : i32
    %c0_i32_1 = arith.constant 0 : i32
    return %arg0, %c0_i32, %c0_i32_0 : i32, i32, i32
  }
  func.func @transform_1(%arg0: i32) -> (i32, i32, i32) {
    %c0_i32 = arith.constant 0 : i32
    %c0_i32_0 = arith.constant 0 : i32
    %c0_i32_1 = arith.constant 0 : i32
    return %arg0, %c0_i32, %c0_i32_0 : i32, i32, i32
  }
  func.func @transform_2(%arg0: i32) -> (i32, i32, i32) {
    %c0_i32 = arith.constant 0 : i32
    %c0_i32_0 = arith.constant 0 : i32
    %c0_i32_1 = arith.constant 0 : i32
    return %arg0, %c0_i32, %c0_i32_0 : i32, i32, i32
  }
  func.func @transform_3(%arg0: i32) -> (i32, i32) {
    %c0_i32 = arith.constant 0 : i32
    %c0_i32_0 = arith.constant 0 : i32
    %c0_i32_1 = arith.constant 0 : i32
    return %c0_i32, %c0_i32_0 : i32, i32
  }
  func.func @transform_4(%arg0: i32) -> (i32, i32) {
    %c0_i32 = arith.constant 0 : i32
    %c0_i32_0 = arith.constant 0 : i32
    %c0_i32_1 = arith.constant 0 : i32
    return %c0_i32, %c0_i32_0 : i32, i32
  }
  func.func @transform_5(%arg0: i32) -> (i32, i32) {
    %c0_i32 = arith.constant 0 : i32
    %c0_i32_0 = arith.constant 0 : i32
    %c0_i32_1 = arith.constant 0 : i32
    return %c0_i32, %c0_i32_0 : i32, i32
  }
  func.func @transform_6(%arg0: i32) -> (i32, i32) {
    %c0_i32 = arith.constant 0 : i32
    %c0_i32_0 = arith.constant 0 : i32
    %c0_i32_1 = arith.constant 0 : i32
    return %c0_i32, %c0_i32_0 : i32, i32
  }
  func.func @transform_7(%arg0: i32) -> (i32, i32, i32) {
    %c0_i32 = arith.constant 0 : i32
    %c0_i32_0 = arith.constant 0 : i32
    %c0_i32_1 = arith.constant 0 : i32
    return %arg0, %c0_i32, %c0_i32_0 : i32, i32, i32
  }
}

module attributes {stable_mosaic.version = 11 : i64} {
  func.func @_dp_step_kernel(%arg0: i32, %arg1: memref<1x81x8xbf16, #tpu.memory_space<vmem>>, %arg2: memref<1x9x72xbf16, #tpu.memory_space<vmem>>, %arg3: memref<8x36xbf16, #tpu.memory_space<vmem>>, %arg4: memref<72x36xbf16, #tpu.memory_space<vmem>>, %arg5: memref<1x36xf32, #tpu.memory_space<vmem>>, %arg6: memref<1x9x36xbf16, #tpu.memory_space<vmem>>, %arg7: memref<81x36xf32, #tpu.memory_space<vmem>>) attributes {dimension_semantics = [#tpu.dimension_semantics<parallel>], iteration_bounds = array<i64: 2>, scalar_prefetch = 0 : i64, scratch_operands = 1 : i64, tpu.core_type = #tpu.core_type<tc>, window_params = [{transform_indices = @transform_0, window_bounds = array<i64: 1, 81, 8>}, {transform_indices = @transform_1, window_bounds = array<i64: 1, 9, 72>}, {pipeline_mode = #tpu.pipeline_mode<synchronous>, transform_indices = @transform_2, window_bounds = array<i64: 8, 36>}, {pipeline_mode = #tpu.pipeline_mode<synchronous>, transform_indices = @transform_3, window_bounds = array<i64: 72, 36>}, {pipeline_mode = #tpu.pipeline_mode<synchronous>, transform_indices = @transform_4, window_bounds = array<i64: 1, 36>}, {transform_indices = @transform_5, window_bounds = array<i64: 1, 9, 36>}]} {
    %c0 = arith.constant 0 : index
    %c0_0 = arith.constant 0 : index
    %c0_1 = arith.constant 0 : index
    %0 = vector.load %arg1[%c0, %c0_0, %c0_1] : memref<1x81x8xbf16, #tpu.memory_space<vmem>>, vector<1x81x8xbf16>
    %1 = vector.shape_cast %0 : vector<1x81x8xbf16> to vector<81x8xbf16>
    %c0_2 = arith.constant 0 : index
    %c0_3 = arith.constant 0 : index
    %2 = vector.load %arg3[%c0_2, %c0_3] : memref<8x36xbf16, #tpu.memory_space<vmem>>, vector<8x36xbf16>
    %cst = arith.constant dense<0.000000e+00> : vector<81x36xf32>
    %3 = tpu.matmul %1, %2, %cst {dimension_numbers = #tpu.dot_dimension_numbers<[1], [0], [0], [1], [0, 0, 1, 1], [], []>} : vector<81x8xbf16>, vector<8x36xbf16>, vector<81x36xf32> -> vector<81x36xf32>
    %c0_4 = arith.constant 0 : index
    %c0_5 = arith.constant 0 : index
    %4 = vector.load %arg5[%c0_4, %c0_5] : memref<1x36xf32, #tpu.memory_space<vmem>>, vector<1x36xf32>
    %5 = vector.broadcast %4 : vector<1x36xf32> to vector<81x36xf32>
    %6 = arith.addf %3, %5 : vector<81x36xf32>
    %c0_6 = arith.constant 0 : index
    %c0_7 = arith.constant 0 : index
    %7 = vector.load %arg7[%c0_6, %c0_7] : memref<81x36xf32, #tpu.memory_space<vmem>>, vector<81x36xf32>
    tpu.vector_store %arg7[%c0_6, %c0_7], %6 {strides = array<i32>} : memref<81x36xf32, #tpu.memory_space<vmem>>, vector<81x36xf32>,
    %c0_8 = arith.constant 0 : index
    %c0_9 = arith.constant 0 : index
    %c0_10 = arith.constant 0 : index
    %8 = vector.load %arg2[%c0_8, %c0_9, %c0_10] : memref<1x9x72xbf16, #tpu.memory_space<vmem>>, vector<1x9x72xbf16>
    %9 = vector.shape_cast %8 : vector<1x9x72xbf16> to vector<9x72xbf16>
    %c0_11 = arith.constant 0 : index
    %c0_12 = arith.constant 0 : index
    %10 = vector.load %arg4[%c0_11, %c0_12] : memref<72x36xbf16, #tpu.memory_space<vmem>>, vector<72x36xbf16>
    %cst_13 = arith.constant dense<0.000000e+00> : vector<9x36xf32>
    %11 = tpu.matmul %9, %10, %cst_13 {dimension_numbers = #tpu.dot_dimension_numbers<[1], [0], [0], [1], [0, 0, 1, 1], [], []>} : vector<9x72xbf16>, vector<72x36xbf16>, vector<9x36xf32> -> vector<9x36xf32>
    %c0_14 = arith.constant 0 : index
    %c0_15 = arith.constant 0 : index
    %12 = vector.load %arg7[%c0_14, %c0_15] : memref<81x36xf32, #tpu.memory_space<vmem>>, vector<9x36xf32>
    %13 = arith.addf %12, %11 : vector<9x36xf32>
    %cst_16 = arith.constant dense<0xFF800000> : vector<36xf32>
    %14 = vector.multi_reduction <maximumf>, %13, %cst_16 [0] : vector<9x36xf32> to vector<36xf32>
    %15 = vector.shape_cast %14 : vector<36xf32> to vector<1x36xf32>
    %16 = arith.negf %15 : vector<1x36xf32>
    %17 = math.exp %16 : vector<1x36xf32>
    %cst_17 = arith.constant 1.000000e+00 : f32
    %18 = vector.broadcast %cst_17 : f32 to vector<1x36xf32>
    %19 = arith.addf %18, %17 : vector<1x36xf32>
    %20 = arith.divf %18, %19 : vector<1x36xf32>
    %21 = arith.truncf %20 : vector<1x36xf32> to vector<1x36xbf16>
    %c0_18 = arith.constant 0 : index
    %c0_19 = arith.constant 0 : index
    %c0_20 = arith.constant 0 : index
    %22 = vector.load %arg6[%c0_18, %c0_19, %c0_20] : memref<1x9x36xbf16, #tpu.memory_space<vmem>>, vector<1x1x36xbf16>
    %23 = vector.shape_cast %22 : vector<1x1x36xbf16> to vector<1x36xbf16>
    %24 = vector.shape_cast %21 : vector<1x36xbf16> to vector<1x1x36xbf16>
    tpu.vector_store %arg6[%c0_18, %c0_19, %c0_20], %24 {strides = array<i32>} : memref<1x9x36xbf16, #tpu.memory_space<vmem>>, vector<1x1x36xbf16>,
    %c9 = arith.constant 9 : index
    %c0_21 = arith.constant 0 : index
    %25 = vector.load %arg7[%c9, %c0_21] : memref<81x36xf32, #tpu.memory_space<vmem>>, vector<9x36xf32>
    %26 = arith.addf %25, %11 : vector<9x36xf32>
    %cst_22 = arith.constant dense<0xFF800000> : vector<36xf32>
    %27 = vector.multi_reduction <maximumf>, %26, %cst_22 [0] : vector<9x36xf32> to vector<36xf32>
    %28 = vector.shape_cast %27 : vector<36xf32> to vector<1x36xf32>
    %29 = arith.negf %28 : vector<1x36xf32>
    %30 = math.exp %29 : vector<1x36xf32>
    %cst_23 = arith.constant 1.000000e+00 : f32
    %31 = vector.broadcast %cst_23 : f32 to vector<1x36xf32>
    %32 = arith.addf %31, %30 : vector<1x36xf32>
    %33 = arith.divf %31, %32 : vector<1x36xf32>
    %34 = arith.truncf %33 : vector<1x36xf32> to vector<1x36xbf16>
    %c0_24 = arith.constant 0 : index
    %c1 = arith.constant 1 : index
    %c0_25 = arith.constant 0 : index
    %35 = vector.load %arg6[%c0_24, %c1, %c0_25] : memref<1x9x36xbf16, #tpu.memory_space<vmem>>, vector<1x1x36xbf16>
    %36 = vector.shape_cast %35 : vector<1x1x36xbf16> to vector<1x36xbf16>
    %37 = vector.shape_cast %34 : vector<1x36xbf16> to vector<1x1x36xbf16>
    tpu.vector_store %arg6[%c0_24, %c1, %c0_25], %37 {strides = array<i32>} : memref<1x9x36xbf16, #tpu.memory_space<vmem>>, vector<1x1x36xbf16>,
    %c18 = arith.constant 18 : index
    %c0_26 = arith.constant 0 : index
    %38 = vector.load %arg7[%c18, %c0_26] : memref<81x36xf32, #tpu.memory_space<vmem>>, vector<9x36xf32>
    %39 = arith.addf %38, %11 : vector<9x36xf32>
    %cst_27 = arith.constant dense<0xFF800000> : vector<36xf32>
    %40 = vector.multi_reduction <maximumf>, %39, %cst_27 [0] : vector<9x36xf32> to vector<36xf32>
    %41 = vector.shape_cast %40 : vector<36xf32> to vector<1x36xf32>
    %42 = arith.negf %41 : vector<1x36xf32>
    %43 = math.exp %42 : vector<1x36xf32>
    %cst_28 = arith.constant 1.000000e+00 : f32
    %44 = vector.broadcast %cst_28 : f32 to vector<1x36xf32>
    %45 = arith.addf %44, %43 : vector<1x36xf32>
    %46 = arith.divf %44, %45 : vector<1x36xf32>
    %47 = arith.truncf %46 : vector<1x36xf32> to vector<1x36xbf16>
    %c0_29 = arith.constant 0 : index
    %c2 = arith.constant 2 : index
    %c0_30 = arith.constant 0 : index
    %48 = vector.load %arg6[%c0_29, %c2, %c0_30] : memref<1x9x36xbf16, #tpu.memory_space<vmem>>, vector<1x1x36xbf16>
    %49 = vector.shape_cast %48 : vector<1x1x36xbf16> to vector<1x36xbf16>
    %50 = vector.shape_cast %47 : vector<1x36xbf16> to vector<1x1x36xbf16>
    tpu.vector_store %arg6[%c0_29, %c2, %c0_30], %50 {strides = array<i32>} : memref<1x9x36xbf16, #tpu.memory_space<vmem>>, vector<1x1x36xbf16>,
    %c27 = arith.constant 27 : index
    %c0_31 = arith.constant 0 : index
    %51 = vector.load %arg7[%c27, %c0_31] : memref<81x36xf32, #tpu.memory_space<vmem>>, vector<9x36xf32>
    %52 = arith.addf %51, %11 : vector<9x36xf32>
    %cst_32 = arith.constant dense<0xFF800000> : vector<36xf32>
    %53 = vector.multi_reduction <maximumf>, %52, %cst_32 [0] : vector<9x36xf32> to vector<36xf32>
    %54 = vector.shape_cast %53 : vector<36xf32> to vector<1x36xf32>
    %55 = arith.negf %54 : vector<1x36xf32>
    %56 = math.exp %55 : vector<1x36xf32>
    %cst_33 = arith.constant 1.000000e+00 : f32
    %57 = vector.broadcast %cst_33 : f32 to vector<1x36xf32>
    %58 = arith.addf %57, %56 : vector<1x36xf32>
    %59 = arith.divf %57, %58 : vector<1x36xf32>
    %60 = arith.truncf %59 : vector<1x36xf32> to vector<1x36xbf16>
    %c0_34 = arith.constant 0 : index
    %c3 = arith.constant 3 : index
    %c0_35 = arith.constant 0 : index
    %61 = vector.load %arg6[%c0_34, %c3, %c0_35] : memref<1x9x36xbf16, #tpu.memory_space<vmem>>, vector<1x1x36xbf16>
    %62 = vector.shape_cast %61 : vector<1x1x36xbf16> to vector<1x36xbf16>
    %63 = vector.shape_cast %60 : vector<1x36xbf16> to vector<1x1x36xbf16>
    tpu.vector_store %arg6[%c0_34, %c3, %c0_35], %63 {strides = array<i32>} : memref<1x9x36xbf16, #tpu.memory_space<vmem>>, vector<1x1x36xbf16>,
    %c36 = arith.constant 36 : index
    %c0_36 = arith.constant 0 : index
    %64 = vector.load %arg7[%c36, %c0_36] : memref<81x36xf32, #tpu.memory_space<vmem>>, vector<9x36xf32>
    %65 = arith.addf %64, %11 : vector<9x36xf32>
    %cst_37 = arith.constant dense<0xFF800000> : vector<36xf32>
    %66 = vector.multi_reduction <maximumf>, %65, %cst_37 [0] : vector<9x36xf32> to vector<36xf32>
    %67 = vector.shape_cast %66 : vector<36xf32> to vector<1x36xf32>
    %68 = arith.negf %67 : vector<1x36xf32>
    %69 = math.exp %68 : vector<1x36xf32>
    %cst_38 = arith.constant 1.000000e+00 : f32
    %70 = vector.broadcast %cst_38 : f32 to vector<1x36xf32>
    %71 = arith.addf %70, %69 : vector<1x36xf32>
    %72 = arith.divf %70, %71 : vector<1x36xf32>
    %73 = arith.truncf %72 : vector<1x36xf32> to vector<1x36xbf16>
    %c0_39 = arith.constant 0 : index
    %c4 = arith.constant 4 : index
    %c0_40 = arith.constant 0 : index
    %74 = vector.load %arg6[%c0_39, %c4, %c0_40] : memref<1x9x36xbf16, #tpu.memory_space<vmem>>, vector<1x1x36xbf16>
    %75 = vector.shape_cast %74 : vector<1x1x36xbf16> to vector<1x36xbf16>
    %76 = vector.shape_cast %73 : vector<1x36xbf16> to vector<1x1x36xbf16>
    tpu.vector_store %arg6[%c0_39, %c4, %c0_40], %76 {strides = array<i32>} : memref<1x9x36xbf16, #tpu.memory_space<vmem>>, vector<1x1x36xbf16>,
    %c45 = arith.constant 45 : index
    %c0_41 = arith.constant 0 : index
    %77 = vector.load %arg7[%c45, %c0_41] : memref<81x36xf32, #tpu.memory_space<vmem>>, vector<9x36xf32>
    %78 = arith.addf %77, %11 : vector<9x36xf32>
    %cst_42 = arith.constant dense<0xFF800000> : vector<36xf32>
    %79 = vector.multi_reduction <maximumf>, %78, %cst_42 [0] : vector<9x36xf32> to vector<36xf32>
    %80 = vector.shape_cast %79 : vector<36xf32> to vector<1x36xf32>
    %81 = arith.negf %80 : vector<1x36xf32>
    %82 = math.exp %81 : vector<1x36xf32>
    %cst_43 = arith.constant 1.000000e+00 : f32
    %83 = vector.broadcast %cst_43 : f32 to vector<1x36xf32>
    %84 = arith.addf %83, %82 : vector<1x36xf32>
    %85 = arith.divf %83, %84 : vector<1x36xf32>
    %86 = arith.truncf %85 : vector<1x36xf32> to vector<1x36xbf16>
    %c0_44 = arith.constant 0 : index
    %c5 = arith.constant 5 : index
    %c0_45 = arith.constant 0 : index
    %87 = vector.load %arg6[%c0_44, %c5, %c0_45] : memref<1x9x36xbf16, #tpu.memory_space<vmem>>, vector<1x1x36xbf16>
    %88 = vector.shape_cast %87 : vector<1x1x36xbf16> to vector<1x36xbf16>
    %89 = vector.shape_cast %86 : vector<1x36xbf16> to vector<1x1x36xbf16>
    tpu.vector_store %arg6[%c0_44, %c5, %c0_45], %89 {strides = array<i32>} : memref<1x9x36xbf16, #tpu.memory_space<vmem>>, vector<1x1x36xbf16>,
    %c54 = arith.constant 54 : index
    %c0_46 = arith.constant 0 : index
    %90 = vector.load %arg7[%c54, %c0_46] : memref<81x36xf32, #tpu.memory_space<vmem>>, vector<9x36xf32>
    %91 = arith.addf %90, %11 : vector<9x36xf32>
    %cst_47 = arith.constant dense<0xFF800000> : vector<36xf32>
    %92 = vector.multi_reduction <maximumf>, %91, %cst_47 [0] : vector<9x36xf32> to vector<36xf32>
    %93 = vector.shape_cast %92 : vector<36xf32> to vector<1x36xf32>
    %94 = arith.negf %93 : vector<1x36xf32>
    %95 = math.exp %94 : vector<1x36xf32>
    %cst_48 = arith.constant 1.000000e+00 : f32
    %96 = vector.broadcast %cst_48 : f32 to vector<1x36xf32>
    %97 = arith.addf %96, %95 : vector<1x36xf32>
    %98 = arith.divf %96, %97 : vector<1x36xf32>
    %99 = arith.truncf %98 : vector<1x36xf32> to vector<1x36xbf16>
    %c0_49 = arith.constant 0 : index
    %c6 = arith.constant 6 : index
    %c0_50 = arith.constant 0 : index
    %100 = vector.load %arg6[%c0_49, %c6, %c0_50] : memref<1x9x36xbf16, #tpu.memory_space<vmem>>, vector<1x1x36xbf16>
    %101 = vector.shape_cast %100 : vector<1x1x36xbf16> to vector<1x36xbf16>
    %102 = vector.shape_cast %99 : vector<1x36xbf16> to vector<1x1x36xbf16>
    tpu.vector_store %arg6[%c0_49, %c6, %c0_50], %102 {strides = array<i32>} : memref<1x9x36xbf16, #tpu.memory_space<vmem>>, vector<1x1x36xbf16>,
    %c63 = arith.constant 63 : index
    %c0_51 = arith.constant 0 : index
    %103 = vector.load %arg7[%c63, %c0_51] : memref<81x36xf32, #tpu.memory_space<vmem>>, vector<9x36xf32>
    %104 = arith.addf %103, %11 : vector<9x36xf32>
    %cst_52 = arith.constant dense<0xFF800000> : vector<36xf32>
    %105 = vector.multi_reduction <maximumf>, %104, %cst_52 [0] : vector<9x36xf32> to vector<36xf32>
    %106 = vector.shape_cast %105 : vector<36xf32> to vector<1x36xf32>
    %107 = arith.negf %106 : vector<1x36xf32>
    %108 = math.exp %107 : vector<1x36xf32>
    %cst_53 = arith.constant 1.000000e+00 : f32
    %109 = vector.broadcast %cst_53 : f32 to vector<1x36xf32>
    %110 = arith.addf %109, %108 : vector<1x36xf32>
    %111 = arith.divf %109, %110 : vector<1x36xf32>
    %112 = arith.truncf %111 : vector<1x36xf32> to vector<1x36xbf16>
    %c0_54 = arith.constant 0 : index
    %c7 = arith.constant 7 : index
    %c0_55 = arith.constant 0 : index
    %113 = vector.load %arg6[%c0_54, %c7, %c0_55] : memref<1x9x36xbf16, #tpu.memory_space<vmem>>, vector<1x1x36xbf16>
    %114 = vector.shape_cast %113 : vector<1x1x36xbf16> to vector<1x36xbf16>
    %115 = vector.shape_cast %112 : vector<1x36xbf16> to vector<1x1x36xbf16>
    tpu.vector_store %arg6[%c0_54, %c7, %c0_55], %115 {strides = array<i32>} : memref<1x9x36xbf16, #tpu.memory_space<vmem>>, vector<1x1x36xbf16>,
    %c72 = arith.constant 72 : index
    %c0_56 = arith.constant 0 : index
    %116 = vector.load %arg7[%c72, %c0_56] : memref<81x36xf32, #tpu.memory_space<vmem>>, vector<9x36xf32>
    %117 = arith.addf %116, %11 : vector<9x36xf32>
    %cst_57 = arith.constant dense<0xFF800000> : vector<36xf32>
    %118 = vector.multi_reduction <maximumf>, %117, %cst_57 [0] : vector<9x36xf32> to vector<36xf32>
    %119 = vector.shape_cast %118 : vector<36xf32> to vector<1x36xf32>
    %120 = arith.negf %119 : vector<1x36xf32>
    %121 = math.exp %120 : vector<1x36xf32>
    %cst_58 = arith.constant 1.000000e+00 : f32
    %122 = vector.broadcast %cst_58 : f32 to vector<1x36xf32>
    %123 = arith.addf %122, %121 : vector<1x36xf32>
    %124 = arith.divf %122, %123 : vector<1x36xf32>
    %125 = arith.truncf %124 : vector<1x36xf32> to vector<1x36xbf16>
    %c0_59 = arith.constant 0 : index
    %c8 = arith.constant 8 : index
    %c0_60 = arith.constant 0 : index
    %126 = vector.load %arg6[%c0_59, %c8, %c0_60] : memref<1x9x36xbf16, #tpu.memory_space<vmem>>, vector<1x1x36xbf16>
    %127 = vector.shape_cast %126 : vector<1x1x36xbf16> to vector<1x36xbf16>
    %128 = vector.shape_cast %125 : vector<1x36xbf16> to vector<1x1x36xbf16>
    tpu.vector_store %arg6[%c0_59, %c8, %c0_60], %128 {strides = array<i32>} : memref<1x9x36xbf16, #tpu.memory_space<vmem>>, vector<1x1x36xbf16>,
    return
  }
  func.func @transform_0(%arg0: i32) -> (i32, i32, i32) {
    %c0_i32 = arith.constant 0 : i32
    %c0_i32_0 = arith.constant 0 : i32
    %c0_i32_1 = arith.constant 0 : i32
    return %arg0, %c0_i32, %c0_i32_0 : i32, i32, i32
  }
  func.func @transform_1(%arg0: i32) -> (i32, i32, i32) {
    %c0_i32 = arith.constant 0 : i32
    %c0_i32_0 = arith.constant 0 : i32
    %c0_i32_1 = arith.constant 0 : i32
    return %arg0, %c0_i32, %c0_i32_0 : i32, i32, i32
  }
  func.func @transform_2(%arg0: i32) -> (i32, i32) {
    %c0_i32 = arith.constant 0 : i32
    %c0_i32_0 = arith.constant 0 : i32
    %c0_i32_1 = arith.constant 0 : i32
    return %c0_i32, %c0_i32_0 : i32, i32
  }
  func.func @transform_3(%arg0: i32) -> (i32, i32) {
    %c0_i32 = arith.constant 0 : i32
    %c0_i32_0 = arith.constant 0 : i32
    %c0_i32_1 = arith.constant 0 : i32
    return %c0_i32, %c0_i32_0 : i32, i32
  }
  func.func @transform_4(%arg0: i32) -> (i32, i32) {
    %c0_i32 = arith.constant 0 : i32
    %c0_i32_0 = arith.constant 0 : i32
    %c0_i32_1 = arith.constant 0 : i32
    return %c0_i32, %c0_i32_0 : i32, i32
  }
  func.func @transform_5(%arg0: i32) -> (i32, i32, i32) {
    %c0_i32 = arith.constant 0 : i32
    %c0_i32_0 = arith.constant 0 : i32
    %c0_i32_1 = arith.constant 0 : i32
    return %arg0, %c0_i32, %c0_i32_0 : i32, i32, i32
  }
}

module attributes {stable_mosaic.version = 11 : i64} {
  func.func @_linear_sigmoid_kernel(%arg0: i32, %arg1: memref<168x4xbf16, #tpu.memory_space<vmem>>, %arg2: memref<168x8xbf16, #tpu.memory_space<vmem>>, %arg3: memref<4x128xbf16, #tpu.memory_space<vmem>>, %arg4: memref<8x128xbf16, #tpu.memory_space<vmem>>, %arg5: memref<1x128xf32, #tpu.memory_space<vmem>>, %arg6: memref<168x128xf32, #tpu.memory_space<vmem>>) attributes {dimension_semantics = [#tpu.dimension_semantics<parallel>], iteration_bounds = array<i64: 1>, scalar_prefetch = 0 : i64, scratch_operands = 0 : i64, tpu.core_type = #tpu.core_type<tc>, window_params = [{transform_indices = @transform_0, window_bounds = array<i64: 168, 4>}, {transform_indices = @transform_1, window_bounds = array<i64: 168, 8>}, {pipeline_mode = #tpu.pipeline_mode<synchronous>, transform_indices = @transform_2, window_bounds = array<i64: 4, 128>}, {pipeline_mode = #tpu.pipeline_mode<synchronous>, transform_indices = @transform_3, window_bounds = array<i64: 8, 128>}, {pipeline_mode = #tpu.pipeline_mode<synchronous>, transform_indices = @transform_4, window_bounds = array<i64: 1, 128>}, {transform_indices = @transform_5, window_bounds = array<i64: 168, 128>}]} {
    %c0 = arith.constant 0 : index
    %c0_0 = arith.constant 0 : index
    %0 = vector.load %arg1[%c0, %c0_0] : memref<168x4xbf16, #tpu.memory_space<vmem>>, vector<168x4xbf16>
    %c0_1 = arith.constant 0 : index
    %c0_2 = arith.constant 0 : index
    %1 = vector.load %arg3[%c0_1, %c0_2] : memref<4x128xbf16, #tpu.memory_space<vmem>>, vector<4x128xbf16>
    %cst = arith.constant dense<0.000000e+00> : vector<168x128xf32>
    %2 = tpu.matmul %0, %1, %cst {dimension_numbers = #tpu.dot_dimension_numbers<[1], [0], [0], [1], [0, 0, 1, 1], [], []>} : vector<168x4xbf16>, vector<4x128xbf16>, vector<168x128xf32> -> vector<168x128xf32>
    %c0_3 = arith.constant 0 : index
    %c0_4 = arith.constant 0 : index
    %3 = vector.load %arg2[%c0_3, %c0_4] : memref<168x8xbf16, #tpu.memory_space<vmem>>, vector<168x8xbf16>
    %c0_5 = arith.constant 0 : index
    %c0_6 = arith.constant 0 : index
    %4 = vector.load %arg4[%c0_5, %c0_6] : memref<8x128xbf16, #tpu.memory_space<vmem>>, vector<8x128xbf16>
    %cst_7 = arith.constant dense<0.000000e+00> : vector<168x128xf32>
    %5 = tpu.matmul %3, %4, %cst_7 {dimension_numbers = #tpu.dot_dimension_numbers<[1], [0], [0], [1], [0, 0, 1, 1], [], []>} : vector<168x8xbf16>, vector<8x128xbf16>, vector<168x128xf32> -> vector<168x128xf32>
    %6 = arith.addf %2, %5 : vector<168x128xf32>
    %c0_8 = arith.constant 0 : index
    %c0_9 = arith.constant 0 : index
    %7 = vector.load %arg5[%c0_8, %c0_9] : memref<1x128xf32, #tpu.memory_space<vmem>>, vector<1x128xf32>
    %8 = vector.broadcast %7 : vector<1x128xf32> to vector<168x128xf32>
    %9 = arith.addf %6, %8 : vector<168x128xf32>
    %10 = arith.negf %9 : vector<168x128xf32>
    %11 = math.exp %10 : vector<168x128xf32>
    %cst_10 = arith.constant 1.000000e+00 : f32
    %12 = vector.broadcast %cst_10 : f32 to vector<168x128xf32>
    %13 = arith.addf %12, %11 : vector<168x128xf32>
    %14 = arith.divf %12, %13 : vector<168x128xf32>
    %c0_11 = arith.constant 0 : index
    %c0_12 = arith.constant 0 : index
    %15 = vector.load %arg6[%c0_11, %c0_12] : memref<168x128xf32, #tpu.memory_space<vmem>>, vector<168x128xf32>
    tpu.vector_store %arg6[%c0_11, %c0_12], %14 {strides = array<i32>} : memref<168x128xf32, #tpu.memory_space<vmem>>, vector<168x128xf32>,
    return
  }
  func.func @transform_0(%arg0: i32) -> (i32, i32) {
    %c0_i32 = arith.constant 0 : i32
    %c0_i32_0 = arith.constant 0 : i32
    return %arg0, %c0_i32 : i32, i32
  }
  func.func @transform_1(%arg0: i32) -> (i32, i32) {
    %c0_i32 = arith.constant 0 : i32
    %c0_i32_0 = arith.constant 0 : i32
    return %arg0, %c0_i32 : i32, i32
  }
  func.func @transform_2(%arg0: i32) -> (i32, i32) {
    %c0_i32 = arith.constant 0 : i32
    %c0_i32_0 = arith.constant 0 : i32
    %c0_i32_1 = arith.constant 0 : i32
    return %c0_i32, %c0_i32_0 : i32, i32
  }
  func.func @transform_3(%arg0: i32) -> (i32, i32) {
    %c0_i32 = arith.constant 0 : i32
    %c0_i32_0 = arith.constant 0 : i32
    %c0_i32_1 = arith.constant 0 : i32
    return %c0_i32, %c0_i32_0 : i32, i32
  }
  func.func @transform_4(%arg0: i32) -> (i32, i32) {
    %c0_i32 = arith.constant 0 : i32
    %c0_i32_0 = arith.constant 0 : i32
    %c0_i32_1 = arith.constant 0 : i32
    return %c0_i32, %c0_i32_0 : i32, i32
  }
  func.func @transform_5(%arg0: i32) -> (i32, i32) {
    %c0_i32 = arith.constant 0 : i32
    %c0_i32_0 = arith.constant 0 : i32
    return %arg0, %c0_i32 : i32, i32
  }
}

</mosaic_0001>

<bundles_post_ra>
// kernel: tile.27
= control target key start
LH: loop header
LB: loop body
LE: loop exit
PB: predicated region body
PF: predicated region fallthrough
CT: control target
= control target key end

     0   :  { %vm146_vm0 = vcmask 64512   ;;  %v257_v24 = vmov 0.0   ;;  %s295_s0 = inlined_call_operand.vmem [shape: bf16[8,9,4], index: 0, kind: input, shape index: {}]   ;;  %s296_s1 = inlined_call_operand.vmem [shape: bf16[8,36], index: 1, kind: output, shape index: {}]  }
   0x1   :  { %v233_v0 = vld [vmem:[%s295_s0 + $0xa] sm:$0xff]   ;;  %v237_v1 = vld [vmem:[%s295_s0 + $0x2] sm:$0xff]   ;;  %v141_v2 = vld [vmem:[%s295_s0] sm:$0x3] }
   0x2   :  { %v17_v3 = vunpack.c.h.bf16 %v233_v0  ;;  %v49_v4 = vunpack.c.l.bf16 %v233_v0  ;;  %v81_v5 = vunpack.c.h.bf16 %v237_v1  ;;  %v113_v6 = vunpack.c.l.bf16 %v237_v1 }
   0x3   :  { %v142_v7 = vunpack.c.l.bf16 %v141_v2 }
   0x4   :  { %20 = vst [vmem:[#allocation1 + $0x38] ss:$8 sps:$4 sm:$0xff] %v17_v3   ;;  %52 = vst [vmem:[#allocation1 + $0x28] ss:$8 sps:$4 sm:$0xff] %v49_v4  }
   0x5   :  { %84 = vst [vmem:[#allocation1 + $0x18] ss:$8 sps:$4 sm:$0xff] %v81_v5   ;;  %116 = vst [vmem:[#allocation1 + $0x8] ss:$8 sps:$4 sm:$0xff] %v113_v6  }
   0x6   :  { %144 = vst [vmem:[#allocation1] sm:$0xf] %v142_v7 }
   0xb   :  { %v169_v8 = vld [vmem:[#allocation1 + $0x28] sm:$0xf]   ;;  %v174_v9 = vld [vmem:[#allocation1 + $0x30] sm:$0xf]   ;;  %v179_v10 = vld [vmem:[#allocation1 + $0x38] sm:$0xf]  }
   0xc   :  { %v149_v11 = vld [vmem:[#allocation1 + $0x8] sm:$0xf]   ;;  %v154_v12 = vld [vmem:[#allocation1 + $0x10] sm:$0xf]   ;;  %v159_v13 = vld [vmem:[#allocation1 + $0x18] sm:$0xf]  }
   0xd   :  { %172 = vst.msk [vmem:[#allocation0 + $0x14] sm:$0xf] %vm146_vm0, %v169_v8   ;;  %177 = vst.msk [vmem:[#allocation0 + $0x18] sm:$0xf] %vm146_vm0, %v174_v9   ;;  %v145_v14 = vld [vmem:[#allocation1] sm:$0xf]  }
   0xe   :  { %182 = vst.msk [vmem:[#allocation0 + $0x1c] sm:$0xf] %vm146_vm0, %v179_v10   ;;  %152 = vst.msk [vmem:[#allocation0 + $0x4] sm:$0xf] %vm146_vm0, %v149_v11   ;;  %v164_v15 = vld [vmem:[#allocation1 + $0x20] sm:$0xf]  }
   0xf   :  { %157 = vst.msk [vmem:[#allocation0 + $0x8] sm:$0xf] %vm146_vm0, %v154_v12   ;;  %162 = vst.msk [vmem:[#allocation0 + $0xc] sm:$0xf] %vm146_vm0, %v159_v13   ;;  %v184_v16 = vld [vmem:[#allocation1 + $0x40] sm:$0xf]  }
  0x10   :  { %147 = vst.msk [vmem:[#allocation0] sm:$0xf] %vm146_vm0, %v145_v14   ;;  %167 = vst.msk [vmem:[#allocation0 + $0x10] sm:$0xf] %vm146_vm0, %v164_v15  }
  0x11   :  { %187 = vst.msk [vmem:[#allocation0 + $0x20] sm:$0xf] %vm146_vm0, %v184_v16  }
  0x15   :  { %v210_v17 = vld [vmem:[#allocation0 + $0x18] sm:$0xff] }
  0x16   :  { %v197_v18 = vld [vmem:[#allocation0 + $0x8] sm:$0xff] }
  0x17   :  { %v192_v19 = vld [vmem:[#allocation0] sm:$0xff]  ;;  %v203_v20 = vld [vmem:[#allocation0 + $0x10] sm:$0xff] }
  0x18   :  { %v217_v21 = vld [vmem:[#allocation0 + $0x20] sm:$0xff]  ;;  %v248_v22 = vpack.c.bf16 %v197_v18, %v192_v19  ;;  %v253_v23 = vpack.c.bf16 %v210_v17, %v203_v20 }
  0x19   :  { %v218_v25 = vpack.c.bf16 %v257_v24, %v217_v21 }
  0x1a   :  { %249 = vst [vmem:[%s296_s1] sm:$0xff] %v248_v22   ;;  %255 = vst [vmem:[%s296_s1 + $0x8] sm:$0xff] %v253_v23  }
  0x1b   :  { %244 = vst [vmem:[%s296_s1 + $0x10] sm:$0xf] %v218_v25 }

// kernel: tile.36
= control target key start
LH: loop header
LB: loop body
LE: loop exit
PB: predicated region body
PF: predicated region fallthrough
CT: control target
= control target key end

     0   :  { %s141_s14 = smov 12  ;;  %s162_s15 = smov 3  ;;  %vm133_vm0 = vcmask 1043458   ;;  %vm135_vm1 = vcmask 31744   ;;  %vm147_vm2 = vcmask 294144   ;;  %vm159_vm3 = vcmask 261344   ;;  %s325_s0 = inlined_call_operand.vmem [shape: bf16[4,9,4], index: 0, kind: input, shape index: {}]   ;;  %s326_s1 = inlined_call_operand.vmem [shape: bf16[4,36], index: 1, kind: output, shape index: {}]  }
   0x1   :  { %v270_v0 = vld [vmem:[%s325_s0 + $0x18] sm:$0xff]   ;;  %v271_v1 = vld [vmem:[%s325_s0 + $0x10] sm:$0xff]   ;;  %v272_v2 = vld [vmem:[%s325_s0 + $0x8] sm:$0xff]   ;;  %s165_s16 = smov 12  ;;  %s150_s17 = smov 3  ;;  %vm171_vm4 = vcmask 228544  }
   0x2   :  { %v257_v3 = vunpack.c.h.bf16 %v270_v0  ;;  %v261_v4 = vunpack.c.h.bf16 %v271_v1  ;;  %v265_v5 = vunpack.c.h.bf16 %v272_v2  ;;  %v267_v6 = vld [vmem:[%s325_s0] sm:$0xff]   ;;  %v256_v7 = vunpack.c.l.bf16 %v270_v0  ;;  %s138_s0 = smov 3  ;;  %s153_s18 = smov 12 }
   0x3   :  { %v269_v8 = vunpack.c.h.bf16 %v267_v6  ;;  %v260_v9 = vunpack.c.l.bf16 %v271_v1  ;;  %v264_v10 = vunpack.c.l.bf16 %v272_v2  ;;  %v268_v11 = vunpack.c.l.bf16 %v267_v6  ;;  %s174_s19 = smov 3  ;;  %s177_s20 = smov 12 }
   0x4   :  { %20 = vst [vmem:[#allocation1 + $0x38] sm:$0xff] %v257_v3  ;;  %52 = vst [vmem:[#allocation1 + $0x28] sm:$0xff] %v261_v4  ;;  %s186_s21 = smov 3  ;;  %s189_s22 = smov 12  ;;  %vm183_vm5 = vcmask 195744   ;;  %vm195_vm6 = vcmask 162944  }
   0x5   :  { %84 = vst [vmem:[#allocation1 + $0x18] sm:$0xff] %v265_v5  ;;  %36 = vst [vmem:[#allocation1 + $0x30] sm:$0xff] %v256_v7  ;;  %s282_s23 = smov 32   ;;  %s198_s24 = smov 3  ;;  %vm207_vm7 = vcmask 130144   ;;  %vm219_vm8 = vcmask 97344  }
   0x6   :  { %115 = vst [vmem:[#allocation1 + $0x8] sm:$0xff] %v269_v8  ;;  %68 = vst [vmem:[#allocation1 + $0x20] sm:$0xff] %v260_v9  ;;  %s201_s25 = smov 12  ;;  %s283_s26 = smov 24   ;;  %vm231_vm9 = vcmask 64544   ;;  %v290_v48 = vmov 0.0  }
   0x7   :  { %100 = vst [vmem:[#allocation1 + $0x10] sm:$0xff] %v264_v10  ;;  %128 = vst [vmem:[#allocation1] sm:$0xff] %v268_v11  ;;  %s210_s27 = smov 3  ;;  %s213_s28 = smov 12 }
   0x8   :  { %s222_s29 = smov 3  ;;  %s225_s30 = smov 12 }
   0x9   :  { %s284_s2 = smov 28   ;;  %s129_s3 = smov 3 }
   0xa   :  { %s131_s4 = smov 12  ;;  %s285_s5 = smov 20  }
   0xb   :  { %s286_s6 = smov 16   ;;  %s287_s7 = smov 12  }
   0xc   :  { %s288_s8 = smov 8   ;;  %s289_s9 = smov 4  }
   0xd   :  { %v139_v12 = vld [vmem:[#allocation1 + $0x8] ss:$16 sm:%s138_s0]  }
   0xe   :  { %v142_v13 = vld [vmem:[#allocation1 + $0x8] ss:$16 sm:%s141_s14]   ;;  %v163_v14 = vld [vmem:[#allocation1 + $0x6] ss:$16 sm:%s162_s15]   ;;  %v151_v17 = vld [vmem:[#allocation1 + $0x7] ss:$16 sm:%s150_s17]  }
   0xf   :  { %v144_v15 = vsel %vm133_vm0, %v142_v13, %v139_v12  ;;  %v166_v16 = vld [vmem:[#allocation1 + $0x6] ss:$16 sm:%s165_s16]   ;;  %v154_v18 = vld [vmem:[#allocation1 + $0x7] ss:$16 sm:%s153_s18]   ;;  %v175_v20 = vld [vmem:[#allocation1 + $0x5] ss:$16 sm:%s174_s19]  }
  0x10   :  { %145 = vrot.lane.b32.xlu0 %v144_v15, %s282_s23  ;;  %v168_v19 = vsel %vm133_vm0, %v166_v16, %v163_v14  ;;  %v178_v21 = vld [vmem:[#allocation1 + $0x5] ss:$16 sm:%s177_s20]   ;;  %v156_v22 = vsel %vm133_vm0, %v154_v18, %v151_v17  ;;  %v187_v24 = vld [vmem:[#allocation1 + $0x4] ss:$16 sm:%s186_s21]   ;;  %v199_v26 = vld [vmem:[#allocation1 + $0x3] ss:$16 sm:%s198_s24]  }
  0x11   :  { %169 = vrot.lane.b32.xlu1 %v168_v19, %s283_s26  ;;  %v180_v23 = vsel %vm133_vm0, %v178_v21, %v175_v20  ;;  %v190_v25 = vld [vmem:[#allocation1 + $0x4] ss:$16 sm:%s189_s22]   ;;  %v202_v27 = vld [vmem:[#allocation1 + $0x3] ss:$16 sm:%s201_s25]   ;;  %v130_v29 = vld [vmem:[#allocation1] ss:$16 sm:%s129_s3]  }
  0x12   :  { %v192_v28 = vsel %vm133_vm0, %v190_v25, %v187_v24  ;;  %v132_v30 = vld [vmem:[#allocation1] ss:$16 sm:%s131_s4]   ;;  %v204_v31 = vsel %vm133_vm0, %v202_v27, %v199_v26  ;;  %v211_v32 = vld [vmem:[#allocation1 + $0x2] ss:$16 sm:%s210_s27]   ;;  %v223_v35 = vld [vmem:[#allocation1 + $0x1] ss:$16 sm:%s222_s29]  }
  0x13   :  { %v214_v33 = vld [vmem:[#allocation1 + $0x2] ss:$16 sm:%s213_s28]   ;;  %v134_v34 = vsel %vm133_vm0, %v132_v30, %v130_v29  ;;  %v226_v36 = vld [vmem:[#allocation1 + $0x1] ss:$16 sm:%s225_s30]  }
  0x14   :  { %157 = vrot.lane.b32.xlu0 %v156_v22, %s284_s2  ;;  %136 = vst.msk [vmem:[#allocation0] sm:$0xf] %vm135_vm1, %v134_v34   ;;  %v216_v37 = vsel %vm133_vm0, %v214_v33, %v211_v32  ;;  %v228_v38 = vsel %vm133_vm0, %v226_v36, %v223_v35 }
  0x15   :  { %181 = vrot.lane.b32.xlu1 %v180_v23, %s285_s5 }
  0x18   :  { %193 = vrot.lane.b32.xlu0 %v192_v28, %s286_s6 }
  0x19   :  { %205 = vrot.lane.b32.xlu1 %v204_v31, %s287_s7 }
  0x1c   :  { %217 = vrot.lane.b32.xlu0 %v216_v37, %s288_s8 }
  0x1d   :  { %229 = vrot.lane.b32.xlu1 %v228_v38, %s289_s9 }
  0x82   :  { %v146_v39 = vpop.permute.xlu0 %145  }
  0x83   :  { %148 = vst.msk [vmem:[#allocation0] sm:$0xf] %vm147_vm2, %v146_v39   ;;  %v170_v40 = vpop.permute.xlu1 %169  }
  0x86   :  { %v158_v41 = vpop.permute.xlu0 %157  }
  0x87   :  { %160 = vst.msk [vmem:[#allocation0] sm:$0xf] %vm159_vm3, %v158_v41   ;;  %v182_v42 = vpop.permute.xlu1 %181  }
  0x88   :  { %172 = vst.msk [vmem:[#allocation0] sm:$0xf] %vm171_vm4, %v170_v40  }
  0x89   :  { %184 = vst.msk [vmem:[#allocation0] sm:$0xf] %vm183_vm5, %v182_v42  }
  0x8a   :  { %v194_v43 = vpop.permute.xlu0 %193  }
  0x8b   :  { %196 = vst.msk [vmem:[#allocation0] sm:$0xf] %vm195_vm6, %v194_v43   ;;  %v206_v44 = vpop.permute.xlu1 %205  }
  0x8c   :  { %208 = vst.msk [vmem:[#allocation0] sm:$0xf] %vm207_vm7, %v206_v44  }
  0x8e   :  { %v218_v45 = vpop.permute.xlu0 %217  }
  0x8f   :  { %220 = vst.msk [vmem:[#allocation0] sm:$0xf] %vm219_vm8, %v218_v45   ;;  %v230_v46 = vpop.permute.xlu1 %229  }
  0x90   :  { %232 = vst.msk [vmem:[#allocation0] sm:$0xf] %vm231_vm9, %v230_v46  }
  0x97   :  { %v237_v47 = vld [vmem:[#allocation0] sm:$0xf] }
  0x98   :  { %v238_v49 = vpack.c.bf16 %v290_v48, %v237_v47 }
  0x9a   :  { %240 = vst [vmem:[%s326_s1] sm:$0x3] %v238_v49 }

// kernel: tlm_dp2d_forward.4
= control target key start
LH: loop header
LB: loop body
LE: loop exit
PB: predicated region body
PF: predicated region fallthrough
CT: control target
= control target key end

     0   :  { %s1277_s24 = smov 0   ;;  %s1431_s0 = inlined_call_operand.vmem [shape: bf16[2,81,4], index: 0, kind: input, shape index: {}]   ;;  %s1432_s1 = inlined_call_operand.vmem [shape: bf16[2,81,8], index: 1, kind: input, shape index: {}]   ;;  %s1433_s2 = inlined_call_operand.vmem [shape: bf16[2,9,72], index: 2, kind: input, shape index: {}]   ;;  %s1434_s3 = inlined_call_operand.vmem [shape: bf16[4,36], index: 3, kind: input, shape index: {}]   ;;  %s1435_s4 = inlined_call_operand.vmem [shape: bf16[8,36], index: 4, kind: input, shape index: {}]   ;;  %s1436_s5 = inlined_call_operand.vmem [shape: bf16[72,36], index: 5, kind: input, shape index: {}]   ;;  %s1437_s6 = inlined_call_operand.vmem [shape: f32[1,36], index: 6, kind: input, shape index: {}]   ;;  %s1438_s7 = inlined_call_operand.vmem [shape: bf16[2,9,36], index: 7, kind: output, shape index: {}]  }
   0x1 LB: > { %s1034_s25 = sadd.s32 4294967295, %s1233_s24   ;;  %p1038_p0 = scmp.ge.s32.totalorder %s1233_s24, 1  ;;  %s1233_s24 = sphi %s1277_s24, %s17_s24  }
   0x2   : > { %p257_p1 = scmp.lt.s32.totalorder %s1233_s24, 3 }
   0x4   : > { %p258_p2 = pnand %p1038_p0, %p257_p1 }
   0x5   : > { %v343_v0 = vld [vmem:[%s1435_s4] sm:$0xf] (!%p258_p2)  ;;  %vm391_vm0 = vcmask (!%p258_p2), 1043456   ;;  %vm522_vm1 = vcmask (!%p258_p2), 1041408   ;;  %p299_p3 = scmp.lt.s32.totalorder (!%p258_p2), %s1034_s25, 1  ;;  %v1235_v4 = vmov (!%p258_p2), 0.0  }
   0x6   : > { %261 = sbr.rel (%p258_p2) target bundleno = 325 (0x145), region = 48  ;;  %v331_v1 = vld [vmem:[%s1434_s3] sm:$0x3] (!%p258_p2)  ;;  %1160 = vmatprep.subr.msk.bf16.mxu1 (!%p258_p2), %vm391_vm0, %v343_v0  ;;  %v393_v2 = vsel (!%p258_p2), %vm391_vm0, %v343_v0, 0  ;;  %vm372_vm2 = vcmask (!%p258_p2), 64512   ;;  %vm503_vm3 = vcmask (!%p258_p2), 31744  }
   0x7   : > { %1161 = vmatprep.subr.msk.bf16.mxu0 (!%p258_p2), %vm522_vm1, %v331_v1  ;;  %v524_v3 = vsel (!%p258_p2), %vm522_vm1, %v331_v1, 0  ;;  %1111 = vmatpush3.bf16.msra.mxu1 (!%p258_p2), %v393_v2  ;;  %v1177_v5 = vld [vmem:[%s1436_s5] sm:$0xff] (!%p258_p2)   ;;  %v1178_v10 = vld [vmem:[%s1436_s5 + $0x8] sm:$0xff] (!%p258_p2)   ;;  %v1183_v13 = vld [vmem:[%s1436_s5 + $0x10] sm:$0xff] (!%p258_p2)   ;;  %vm1236_vm4 = vmmov (!%p258_p2), 0   ;;  %vm680_vm5 = vcmask (!%p258_p2), 588800  }
   0x8   : > { %1125 = vmatpush3.bf16.msra.mxu0 (!%p258_p2), %v524_v3  ;;  %1138 = vmatprep.subr.bf16.mxu1 (!%p258_p2), %v1235_v4  ;;  %v1186_v18 = vld [vmem:[%s1436_s5 + $0x18] sm:$0xff] (!%p258_p2)   ;;  %v1189_v19 = vld [vmem:[%s1436_s5 + $0x20] ss:$0 sps:$4 sm:$0xff] (!%p258_p2)   ;;  %vm624_vm6 = vcmask (!%p258_p2), 293888   ;;  %vm635_vm7 = vcmask (!%p258_p2), 286720   ;;  %vm799_vm9 = vcmask (!%p258_p2), 287745  }
   0x9   : > { %v685_v22 = vsel (!%p258_p2), %vm391_vm0, %v1189_v19, 0  ;;  %v1069_v26 = vld [vmem:[%s1437_s6] ss:$0 sm:$0xff] (!%p258_p2)  ;;  %vm749_vm8 = vsmask.f32 (!%p258_p2), 256  ;;  %vm850_vm12 = vcmask (!%p258_p2), 288770  }
   0xa   : > { %vm800_vm10 = vsmask.f32 (!%p258_p2), 1280  ;;  %vm1395_vm11 = vmand (!%p258_p2), %vm635_vm7, %vm749_vm8  ;;  %vm851_vm13 = vsmask.f32 (!%p258_p2), 2304  ;;  %vm901_vm15 = vcmask (!%p258_p2), 289795  }
   0xb   : > { %vm801_vm14 = vmand (!%p258_p2), %vm799_vm9, %vm800_vm10  ;;  %vm902_vm0 = vsmask.f32 (!%p258_p2), 3328  ;;  %vm927_vm10 = vsmask.f32 (!%p258_p2), 7950 }
   0xc   : > { %vm852_vm1 = vmand (!%p258_p2), %vm850_vm12, %vm851_vm13 }
   0xd   : > { %s1442_s25 = smov (!%p299_p3, %s1034_s25), 1  ;;  %vm928_vm13 = vmand %vm901_vm15, %vm927_vm10 }
   0xe   : > { %s1162_s30 = smul.u32 44, %s1442_s25  ;;  %s1088_s20 = sshll.u32 %s1442_s25, 3 }
   0xf   : > { %s313_s23 = scalar_lea.vmem %s1433_s2, %s1088_s20  ;;  %s1392_s11 = scalar_lea.vmem %s1438_s7, %s1088_s20 }
  0x10   : > { %s1299_s10 = scalar_lea.vmem %s1432_s1, %s1162_s30  ;;  %s1304_s13 = scalar_lea.vmem %s1431_s0, %s1162_s30  ;;  %v1190_v23 = vld [vmem:[%s313_s23] sm:$0x1f]  }
  0x11   : > { %v1173_v6 = vld [vmem:[%s1299_s10] sm:$0xff]   ;;  %v1175_v8 = vld [vmem:[%s1299_s10 + $0x8] sm:$0xff]   ;;  %v1179_v11 = vld [vmem:[%s1299_s10 + $0x10] sm:$0xff]  }
  0x12   : > { %v1174_v7 = vld [vmem:[%s1304_s13] sm:$0xff]   ;;  %1112 = vmatprep.mubr.msk.bf16.mxu1 %vm372_vm2, %v1173_v6  ;;  %v1176_v9 = vld [vmem:[%s1304_s13 + $0x8] sm:$0xff]   ;;  %v1180_v12 = vld [vmem:[%s1304_s13 + $0x10] sm:$0xff]  }
  0x13   : > { %1126 = vmatprep.mubr.msk.bf16.mxu0 %vm503_vm3, %v1174_v7  ;;  %1113 = vmatmul.mubr.msk.bf16.vlgmr.msra.gmra.mrb[0].mxu1 %vm372_vm2, %v1175_v8  ;;  %v1181_v14 = vld [vmem:[%s1299_s10 + $0x18] sm:$0xff]   ;;  %v1184_v16 = vld [vmem:[%s1299_s10 + $0x20] sm:$0xff]   ;;  %v1187_v20 = vld [vmem:[%s1299_s10 + $0x28] ss:$0 sps:$4 sm:$0x11]  }
  0x14   : > { %1127 = vmatmul.mubr.msk.bf16.vlgmr.msra.gmra.mrb[0].mxu0 %vm503_vm3, %v1176_v9  ;;  %1139 = vmatpush3.bf16.msra.mxu1 %v1177_v5  ;;  %v1182_v15 = vld [vmem:[%s1304_s13 + $0x18] sm:$0xff]   ;;  %v1185_v17 = vld [vmem:[%s1304_s13 + $0x20] sm:$0xff]   ;;  %v1188_v21 = vld [vmem:[%s1304_s13 + $0x28] ss:$0 sps:$4 sm:$0x11]  }
  0x15   : > { %1140 = vmatprep.subr.bf16.mxu1 %v1235_v4  ;;  %1116 = vmatprep.mubr.msk.bf16.mxu1 %vm372_vm2, %v1179_v11 }
  0x16   : > { %1130 = vmatprep.mubr.msk.bf16.mxu0 %vm503_vm3, %v1180_v12 }
  0x18   : > { %1141 = vmatpush3.bf16.msra.mxu1 %v1178_v10 }
  0x19   : > { %1142 = vmatprep.subr.bf16.mxu1 %v1235_v4 }
  0x1b   : > { %1117 = vmatmul.mubr.msk.bf16.gmra.mrb[4].mxu1 %vm372_vm2, %v1181_v14 }
  0x1c   : > { %1131 = vmatmul.mubr.msk.bf16.gmra.mrb[4].mxu0 %vm503_vm3, %v1182_v15  ;;  %1143 = vmatpush3.bf16.msra.mxu1 %v1183_v13 }
  0x1d   : > { %1144 = vmatprep.subr.bf16.mxu1 %v1235_v4  ;;  %1120 = vmatprep.mubr.msk.bf16.mxu1 %vm372_vm2, %v1184_v16 }
  0x1e   : > { %1134 = vmatprep.mubr.msk.bf16.mxu0 %vm503_vm3, %v1185_v17 }
  0x20   : > { %1145 = vmatpush3.bf16.msra.mxu1 %v1186_v18 }
  0x21   : > { %1146 = vmatprep.subr.bf16.mxu1 %v1235_v4 }
  0x23   : > { %1121 = vmatmul.mubr.msk.bf16.gmra.mrb[8].mxu1 %vm372_vm2, %v1187_v20  ;;  %vm774_vm2 = vsmask.f32 7938 }
  0x24   : > { %1135 = vmatmul.mubr.msk.bf16.gmra.mrb[8].mxu0 %vm503_vm3, %v1188_v21  ;;  %1147 = vmatpush3.bf16.msra.mxu1 %v685_v22  ;;  %vm903_vm3 = vmand %vm901_vm15, %vm902_vm0 }
  0x25   : > { %1148 = vmatprep.mubr.msk.bf16.mxu1 %vm1236_vm4, %v1235_v4  ;;  %vm825_vm4 = vsmask.f32 7942 }
  0x26   : > { %vm826_vm8 = vmand %vm799_vm9, %vm825_vm4 }
  0x2b   : > { %1149 = vmatmul.mubr.msk.bf16.vlgmr.msra.gmra.mrb[12].mxu1 %vm680_vm5, %v1190_v23  ;;  %vm775_vm5 = vmand %vm635_vm7, %vm774_vm2 }
  0xe6   : > { %v1114_v24 = vpop.f32.mrb[0].mxu1 }
  0xe7   : > { %v1128_v25 = vpop.f32.mrb[0].mxu0  ;;  %v429_v27 = vpop.f32.mrb[1].mxu1 }
  0xe8   : > { %v569_v28 = vadd.f32 %v1128_v25, %v1114_v24  ;;  %v560_v29 = vpop.f32.mrb[1].mxu0  ;;  %v1115_v30 = vpop.f32.mrb[2].mxu1 }
  0xe9   : > { %v561_v31 = vadd.f32 %v560_v29, %v429_v27  ;;  %v1129_v32 = vpop.f32.mrb[2].mxu0  ;;  %v432_v33 = vpop.f32.mrb[3].mxu1 }
  0xea   : > { %v615_v34 = vadd.f32 %v1069_v26, %v569_v28  ;;  %v572_v35 = vadd.f32 %v1129_v32, %v1115_v30  ;;  %v563_v36 = vpop.f32.mrb[3].mxu0 }
  0xeb   : > { %v613_v37 = vadd.f32 %v1069_v26, %v561_v31  ;;  %v564_v38 = vadd.f32 %v563_v36, %v432_v33 }
  0xec   : > { %627 = vst.msk [vmem:[#allocation2 + $0x10] sm:$0xff] %vm624_vm6, %v615_v34  ;;  %v616_v39 = vadd.f32 %v1069_v26, %v572_v35 }
  0xed   : > { %625 = vst.msk [vmem:[#allocation2] sm:$0xff] %vm624_vm6, %v613_v37  ;;  %v614_v40 = vadd.f32 %v1069_v26, %v564_v38 }
  0xee   : > { %628 = vst.msk [vmem:[#allocation2 + $0x18] sm:$0xff] %vm624_vm6, %v616_v39  ;;  %v1118_v41 = vpop.f32.mrb[4].mxu1 }
  0xef   : > { %626 = vst.msk [vmem:[#allocation2 + $0x8] sm:$0xff] %vm624_vm6, %v614_v40  ;;  %v1132_v42 = vpop.f32.mrb[4].mxu0  ;;  %v445_v43 = vpop.f32.mrb[5].mxu1 }
  0xf0   : > { %v585_v44 = vadd.f32 %v1132_v42, %v1118_v41  ;;  %v576_v45 = vpop.f32.mrb[5].mxu0  ;;  %v1119_v46 = vpop.f32.mrb[6].mxu1 }
  0xf1   : > { %v577_v47 = vadd.f32 %v576_v45, %v445_v43  ;;  %v1133_v48 = vpop.f32.mrb[6].mxu0  ;;  %v448_v49 = vpop.f32.mrb[7].mxu1 }
  0xf2   : > { %v619_v50 = vadd.f32 %v1069_v26, %v585_v44  ;;  %v588_v51 = vadd.f32 %v1133_v48, %v1119_v46  ;;  %v579_v52 = vpop.f32.mrb[7].mxu0 }
  0xf3   : > { %v617_v53 = vadd.f32 %v1069_v26, %v577_v47  ;;  %v580_v54 = vadd.f32 %v579_v52, %v448_v49  ;;  %v755_v25 = vld [vmem:[#allocation2 + $0x11] sm:$0x1] }
  0xf4   : > { %631 = vst.msk [vmem:[#allocation2 + $0x30] sm:$0xff] %vm624_vm6, %v619_v50  ;;  %v620_v55 = vadd.f32 %v1069_v26, %v588_v51  ;;  %v728_v7 = vld [vmem:[#allocation2] sm:$0xff] }
  0xf5   : > { %629 = vst.msk [vmem:[#allocation2 + $0x20] sm:$0xff] %vm624_vm6, %v617_v53  ;;  %v618_v56 = vadd.f32 %v1069_v26, %v580_v54  ;;  %v779_v9 = vld [vmem:[#allocation2 + $0x12] sm:$0xff] }
  0xf6   : > { %632 = vst.msk [vmem:[#allocation2 + $0x38] sm:$0xff] %vm624_vm6, %v620_v55  ;;  %v1122_v57 = vpop.f32.mrb[8].mxu1  ;;  %v754_v8 = vld [vmem:[#allocation2 + $0x9] sm:$0xff]  ;;  %v729_v24 = vld [vmem:[#allocation2 + $0x8] sm:$0x1] }
  0xf7   : > { %630 = vst.msk [vmem:[#allocation2 + $0x28] sm:$0xff] %vm624_vm6, %v618_v56  ;;  %v1136_v58 = vpop.f32.mrb[8].mxu0  ;;  %v461_v59 = vpop.f32.mrb[9].mxu1 }
  0xf8   : > { %v601_v60 = vadd.f32 %v1136_v58, %v1122_v57  ;;  %v592_v61 = vpop.f32.mrb[9].mxu0  ;;  %v1123_v62 = vpop.f32.mrb[10].mxu1 }
  0xf9   : > { %v593_v63 = vadd.f32 %v592_v61, %v461_v59  ;;  %v1137_v0 = vpop.f32.mrb[10].mxu0  ;;  %v464_v1 = vpop.f32.mrb[11].mxu1 }
  0xfa   : > { %v623_v2 = vadd.f32 %v1069_v26, %v601_v60  ;;  %v595_v3 = vpop.f32.mrb[11].mxu0 }
  0xfb   : > { %v621_v4 = vadd.f32 %v1069_v26, %v593_v63  ;;  %v596_v5 = vadd.f32 %v595_v3, %v464_v1  ;;  %v857_v42 = vld [vmem:[#allocation2 + $0x35] sm:$0x1] }
  0xfc   : > { %636 = vst.msk [vmem:[#allocation2 + $0x50] sm:$0x1] %vm635_vm7, %v623_v2  ;;  %v805_v11 = vld [vmem:[#allocation2 + $0x1b] sm:$0xff]  ;;  %v806_v27 = vld [vmem:[#allocation2 + $0x23] sm:$0x1] }
  0xfd   : > { %633 = vst.msk [vmem:[#allocation2 + $0x40] sm:$0xff] %vm624_vm6, %v621_v4  ;;  %v622_v6 = vadd.f32 %v1069_v26, %v596_v5  ;;  %v881_v18 = vld [vmem:[#allocation2 + $0x36] sm:$0xff]  ;;  %v882_v43 = vld [vmem:[#allocation2 + $0x3e] sm:$0x1] }
  0xfe   : > { %v721_v10 = vpop.f32.mrb[12].mxu1  ;;  %v830_v12 = vld [vmem:[#allocation2 + $0x24] sm:$0xff]  ;;  %v856_v13 = vld [vmem:[#allocation2 + $0x2d] sm:$0xff]  ;;  %v780_v26 = vld [vmem:[#allocation2 + $0x1a] sm:$0x1] }
  0xff   : > { %634 = vst.msk [vmem:[#allocation2 + $0x48] sm:$0xff] %vm624_vm6, %v622_v6  ;;  %v730_v14 = vadd.f32 %v728_v7, %v721_v10  ;;  %v756_v15 = vadd.f32 %v754_v8, %v721_v10  ;;  %v781_v16 = vadd.f32 %v779_v9, %v721_v10  ;;  %v807_v17 = vadd.f32 %v805_v11, %v721_v10  ;;  %v1150_v19 = vpop.f32.mrb[13].mxu1  ;;  %v831_v37 = vld [vmem:[#allocation2 + $0x2c] sm:$0x1] }
 0x100   : > { %v832_v20 = vadd.f32 %v830_v12, %v721_v10  ;;  %v858_v21 = vadd.f32 %v856_v13, %v721_v10  ;;  %v883_v22 = vadd.f32 %v881_v18, %v721_v10  ;;  %v724_v23 = vpop.f32.mrb[14].mxu1 }
 0x101   : > { %v732_v28 = vsel %vm624_vm6, %v730_v14, -inf  ;;  %v758_v29 = vsel %vm624_vm6, %v756_v15, -inf  ;;  %v783_v30 = vsel %vm624_vm6, %v781_v16, -inf  ;;  %v809_v31 = vsel %vm624_vm6, %v807_v17, -inf  ;;  %v1151_v32 = vpop.f32.mrb[15].mxu1 }
 0x102   : > { %v834_v33 = vsel %vm624_vm6, %v832_v20, -inf  ;;  %v860_v34 = vsel %vm624_vm6, %v858_v21, -inf  ;;  %v885_v35 = vsel %vm624_vm6, %v883_v22, -inf  ;;  %v731_v36 = vadd.f32 %v729_v24, %v724_v23 }
 0x103   : > { %v757_v38 = vadd.f32 %v755_v25, %v724_v23  ;;  %v782_v39 = vadd.f32 %v780_v26, %v724_v23  ;;  %v808_v40 = vadd.f32 %v806_v27, %v724_v23  ;;  %v833_v41 = vadd.f32 %v831_v37, %v724_v23  ;;  %v933_v44 = vld [vmem:[#allocation2 + $0x50] sm:$0x1] }
 0x104   : > { %v907_v45 = vld [vmem:[#allocation2 + $0x3f] sm:$0xff]  ;;  %v733_v46 = vsel %vm635_vm7, %v731_v36, -inf  ;;  %v859_v47 = vadd.f32 %v857_v42, %v724_v23  ;;  %v884_v48 = vadd.f32 %v882_v43, %v724_v23  ;;  %v1374_v49 = vadd.f32 %v933_v44, %v724_v23  ;;  %v908_v7 = vld [vmem:[#allocation2 + $0x47] sm:$0x1] }
 0x105   : > { %v909_v50 = vadd.f32 %v907_v45, %v721_v10  ;;  %v734_v51 = vmax.f32 %v732_v28, %v733_v46  ;;  %v759_v52 = vsel %vm635_vm7, %v757_v38, -inf  ;;  %v784_v53 = vsel %vm635_vm7, %v782_v39, -inf }
 0x106   : > { %v932_v54 = vld [vmem:[#allocation2 + $0x48] sm:$0xff]  ;;  %v760_v55 = vmax.f32 %v758_v29, %v759_v52  ;;  %v785_v56 = vmax.f32 %v783_v30, %v784_v53  ;;  %v810_v57 = vsel %vm635_vm7, %v808_v40, -inf  ;;  %v835_v58 = vsel %vm635_vm7, %v833_v41, -inf }
 0x107   : > { %v911_v59 = vsel %vm624_vm6, %v909_v50, -inf  ;;  %v934_v60 = vadd.f32 %v932_v54, %v721_v10  ;;  %v735_v61 = vrot.slane %v734_v51, 4  ;;  %v811_v62 = vmax.f32 %v809_v31, %v810_v57 }
 0x108   : > { %v761_v63 = vrot.slane %v760_v55, 4  ;;  %v786_v0 = vrot.slane %v785_v56, 4  ;;  %v836_v1 = vmax.f32 %v834_v33, %v835_v58  ;;  %v861_v2 = vsel %vm635_vm7, %v859_v47, -inf }
 0x109   : > { %v936_v3 = vsel %vm624_vm6, %v934_v60, -inf  ;;  %v736_v4 = vmax.f32 %v734_v51, %v735_v61  ;;  %v812_v5 = vrot.slane %v811_v62, 4  ;;  %v862_v6 = vmax.f32 %v860_v34, %v861_v2 }
 0x10a   : > { %v762_v8 = vmax.f32 %v760_v55, %v761_v63  ;;  %v787_v9 = vmax.f32 %v785_v56, %v786_v0  ;;  %v837_v11 = vrot.slane %v836_v1, 4  ;;  %v886_v12 = vsel %vm635_vm7, %v884_v48, -inf }
 0x10b   : > { %v737_v13 = vrot.slane %v736_v4, 2  ;;  %v813_v10 = vmax.f32 %v811_v62, %v812_v5  ;;  %v863_v14 = vrot.slane %v862_v6, 4  ;;  %v887_v15 = vmax.f32 %v885_v35, %v886_v12 }
 0x10c   : > { %v763_v16 = vrot.slane %v762_v8, 2  ;;  %v788_v17 = vrot.slane %v787_v9, 2  ;;  %v838_v18 = vmax.f32 %v836_v1, %v837_v11  ;;  %v910_v19 = vadd.f32 %v908_v7, %v724_v23 }
 0x10d   : > { %v738_v20 = vmax.f32 %v736_v4, %v737_v13  ;;  %v814_v21 = vrot.slane %v813_v10, 2  ;;  %v864_v22 = vmax.f32 %v862_v6, %v863_v14  ;;  %v888_v24 = vrot.slane %v887_v15, 4 }
 0x10e   : > { %v764_v25 = vmax.f32 %v762_v8, %v763_v16  ;;  %v789_v26 = vmax.f32 %v787_v9, %v788_v17  ;;  %v839_v27 = vrot.slane %v838_v18, 2  ;;  %v912_v28 = vsel %vm635_vm7, %v910_v19, -inf }
 0x10f   : > { %v739_v29 = vrot.slane %v738_v20, 1  ;;  %v815_v30 = vmax.f32 %v813_v10, %v814_v21  ;;  %v865_v31 = vrot.slane %v864_v22, 2  ;;  %v889_v32 = vmax.f32 %v887_v15, %v888_v24 }
 0x110   : > { %v765_v33 = vrot.slane %v764_v25, 1  ;;  %v790_v34 = vrot.slane %v789_v26, 1  ;;  %v840_v35 = vmax.f32 %v838_v18, %v839_v27  ;;  %v913_v36 = vmax.f32 %v911_v59, %v912_v28  ;;  %v751_v28 = vld [vmem:[%s1392_s11] sm:$0x1] }
 0x111   : > { %v740_v37 = vmax.f32 %v738_v20, %v739_v29  ;;  %v816_v38 = vrot.slane %v815_v30, 1  ;;  %v866_v23 = vmax.f32 %v864_v22, %v865_v31  ;;  %v890_v39 = vrot.slane %v889_v32, 2  ;;  %v802_v31 = vld [vmem:[%s1392_s11] sm:$0x2] }
 0x112   : > { %v766_v40 = vmax.f32 %v764_v25, %v765_v33  ;;  %v791_v41 = vmax.f32 %v789_v26, %v790_v34  ;;  %v841_v42 = vrot.slane %v840_v35, 1  ;;  %v914_v43 = vrot.slane %v913_v36, 4 }
 0x113   : > { %v1077_v44 = vmul.f32 -1.442695, %v740_v37  ;;  %v817_v45 = vmax.f32 %v815_v30, %v816_v38  ;;  %v867_v46 = vrot.slane %v866_v23, 1  ;;  %v891_v47 = vmax.f32 %v889_v32, %v890_v39  ;;  %v904_v39 = vld [vmem:[%s1392_s11] sm:$0x8] }
 0x114   : > { %v1078_v48 = vmul.f32 -1.442695, %v766_v40  ;;  %v1079_v50 = vmul.f32 -1.442695, %v791_v41  ;;  %v842_v51 = vmax.f32 %v840_v35, %v841_v42  ;;  %v915_v52 = vmax.f32 %v913_v36, %v914_v43  ;;  %v853_v35 = vld [vmem:[%s1392_s11] sm:$0x4] }
 0x115   : > { %1191 = vpow2.f32 %v1077_v44  ;;  %v1080_v53 = vmul.f32 -1.442695, %v817_v45  ;;  %v868_v54 = vmax.f32 %v866_v23, %v867_v46  ;;  %v892_v55 = vrot.slane %v891_v47, 1 }
 0x116   : > { %1193 = vpow2.f32 %v1078_v48  ;;  %v1081_v56 = vmul.f32 -1.442695, %v842_v51  ;;  %v916_v57 = vrot.slane %v915_v52, 2  ;;  %v937_v58 = vsel %vm635_vm7, %v1374_v49, -inf }
 0x117   : > { %1195 = vpow2.f32 %v1079_v50  ;;  %v893_v59 = vmax.f32 %v891_v47, %v892_v55  ;;  %v938_v60 = vmax.f32 %v936_v3, %v937_v58  ;;  %v1082_v61 = vmul.f32 -1.442695, %v868_v54 }
 0x118   : > { %v917_v62 = vmax.f32 %v915_v52, %v916_v57  ;;  %1197 = vpow2.f32 %v1081_v56  ;;  %vm876_vm6 = vsmask.f32 7946 }
 0x119   : > { %v1083_v63 = vmul.f32 -1.442695, %v893_v59  ;;  %v939_v0 = vrot.slane %v938_v60, 4  ;;  %1199 = vpow2.f32 %v1080_v53  ;;  %vm877_vm7 = vmand %vm850_vm12, %vm876_vm6 }
 0x11a   : > { %v918_v1 = vrot.slane %v917_v62, 1 }
 0x11b   : > { %1201 = vpow2.f32 %v1083_v63  ;;  %v940_v2 = vmax.f32 %v938_v60, %v939_v0 }
 0x11c   : > { %1203 = vpow2.f32 %v1082_v61  ;;  %v919_v4 = vmax.f32 %v917_v62, %v918_v1  ;;  %v952_v62 = vld [vmem:[%s1392_s11 + $0x4] sm:$0x1] }
 0x11d   : > { %v941_v5 = vrot.slane %v940_v2, 2 }
 0x11e   : > { %v1084_v6 = vmul.f32 -1.442695, %v919_v4 }
 0x11f   : > { %v1192_v7 = vpop.eup %1191  ;;  %v942_v8 = vmax.f32 %v940_v2, %v941_v5 }
 0x120   : > { %v1194_v9 = vpop.eup %1193  ;;  %v744_v49 = vadd.f32 1.0, %v1192_v7  ;;  %1205 = vpow2.f32 %v1084_v6 }
 0x121   : > { %v1196_v11 = vpop.eup %1195  ;;  %v943_v3 = vrot.slane %v942_v8, 1  ;;  %v770_v10 = vadd.f32 1.0, %v1194_v9 }
 0x122   : > { %1207 = vrcp.f32 %v744_v49  ;;  %v795_v12 = vadd.f32 1.0, %v1196_v11  ;;  %v1198_v13 = vpop.eup %1197 }
 0x123   : > { %v944_v14 = vmax.f32 %v942_v8, %v943_v3  ;;  %v1200_v15 = vpop.eup %1199  ;;  %v846_v16 = vadd.f32 1.0, %v1198_v13 }
 0x124   : > { %1209 = vrcp.f32 %v795_v12  ;;  %v821_v21 = vadd.f32 1.0, %v1200_v15 }
 0x125   : > { %v1202_v17 = vpop.eup %1201  ;;  %v1085_v18 = vmul.f32 -1.442695, %v944_v14  ;;  %1211 = vrcp.f32 %v846_v16 }
 0x126   : > { %v1204_v19 = vpop.eup %1203  ;;  %v897_v20 = vadd.f32 1.0, %v1202_v17  ;;  %1213 = vrcp.f32 %v770_v10 }
 0x127   : > { %v872_v22 = vadd.f32 1.0, %v1204_v19 }
 0x128   : > { %1215 = vrcp.f32 %v897_v20 }
 0x129   : > { %1217 = vpow2.f32 %v1085_v18 }
 0x12a   : > { %v1206_v24 = vpop.eup %1205  ;;  %1219 = vrcp.f32 %v821_v21 }
 0x12b   : > { %v923_v25 = vadd.f32 1.0, %v1206_v24  ;;  %1221 = vrcp.f32 %v872_v22 }
 0x12c   : > { %v1208_v26 = vpop.eup %1207 }
 0x12d   : > { %v747_v29 = vpack.c.bf16 %v1208_v26, %v1208_v26  ;;  %1223 = vrcp.f32 %v923_v25 }
 0x12e   : > { %v1210_v30 = vpop.eup %1209 }
 0x12f   : > { %v752_v32 = vsel %vm1395_vm11, %v747_v29, %v751_v28  ;;  %v798_v33 = vpack.c.bf16 %v1210_v30, %v1210_v30  ;;  %v1212_v34 = vpop.eup %1211 }
 0x130   : > { %753 = vst [vmem:[%s1392_s11] sm:$0x1] %v752_v32  ;;  %v1214_v36 = vpop.eup %1213  ;;  %v849_v38 = vpack.c.bf16 %v1212_v34, %v1212_v34 }
 0x131   : > { %v803_v37 = vsel %vm801_vm14, %v798_v33, %v802_v31  ;;  %v773_v46 = vpack.c.bf16 %v1214_v36, %v1214_v36 }
 0x132   : > { %v1216_v23 = vpop.eup %1215  ;;  %804 = vst [vmem:[%s1392_s11] sm:$0x2] %v803_v37  ;;  %v854_v41 = vsel %vm852_vm1, %v849_v38, %v853_v35 }
 0x133   : > { %v1218_v40 = vpop.eup %1217  ;;  %v900_v42 = vpack.c.bf16 %v1216_v23, %v1216_v23  ;;  %855 = vst [vmem:[%s1392_s11] sm:$0x4] %v854_v41 }
 0x134   : > { %v948_v43 = vadd.f32 1.0, %v1218_v40  ;;  %v1220_v44 = vpop.eup %1219 }
 0x135   : > { %v905_v45 = vsel %vm903_vm3, %v900_v42, %v904_v39  ;;  %v1222_v47 = vpop.eup %1221  ;;  %v824_v51 = vpack.c.bf16 %v1220_v44, %v1220_v44 }
 0x136   : > { %906 = vst [vmem:[%s1392_s11] sm:$0x8] %v905_v45  ;;  %1225 = vrcp.f32 %v948_v43  ;;  %v875_v55 = vpack.c.bf16 %v1222_v47, %v1222_v47 }
 0x137   : > { %v776_v48 = vld [vmem:[%s1392_s11] sm:$0x1]  ;;  %v1224_v52 = vpop.eup %1223 }
 0x138   : > { %v777_v50 = vsel %vm775_vm5, %v773_v46, %v776_v48  ;;  %v926_v58 = vpack.c.bf16 %v1224_v52, %v1224_v52 }
 0x139   : > { %778 = vst [vmem:[%s1392_s11] sm:$0x1] %v777_v50  ;;  %v827_v53 = vld [vmem:[%s1392_s11] sm:$0x2] }
 0x13a   : > { %v828_v54 = vsel %vm826_vm8, %v824_v51, %v827_v53  ;;  %v878_v56 = vld [vmem:[%s1392_s11] sm:$0x4] }
 0x13b   : > { %829 = vst [vmem:[%s1392_s11] sm:$0x2] %v828_v54  ;;  %v879_v57 = vsel %vm877_vm7, %v875_v55, %v878_v56 }
 0x13c   : > { %880 = vst [vmem:[%s1392_s11] sm:$0x4] %v879_v57 }
 0x13d   : > { %v929_v59 = vld [vmem:[%s1392_s11] sm:$0x8] }
 0x13e   : > { %v930_v60 = vsel %vm928_vm13, %v926_v58, %v929_v59 }
 0x13f   : > { %931 = vst [vmem:[%s1392_s11] sm:$0x8] %v930_v60 }
 0x140   : > { %v1226_v61 = vpop.eup %1225 }
 0x141   : > { %v951_v63 = vpack.c.bf16 %v1226_v61, %v1226_v61 }
 0x143   : > { %v953_v0 = vsel %vm1395_vm11, %v951_v63, %v952_v62 }
 0x144   : > { %954 = vst [vmem:[%s1392_s11 + $0x4] sm:$0x1] %v953_v0 }
 0x145 PF: > { %s17_s24 = sadd.s32 1, %s1233_s24  }
 0x146   : > { %p14_p4 = scmp.ge.s32.totalorder %s17_s24, 4  }
 0x148   :  { %16 = sbr.rel (!%p14_p4) target bundleno = 1 (0x1), region = 84 }

// kernel: tlm_dp2d_forward.3
= control target key start
LH: loop header
LB: loop body
LE: loop exit
PB: predicated region body
PF: predicated region fallthrough
CT: control target
= control target key end

     0   :  { %s978_s18 = smov 0   ;;  %s1136_s0 = inlined_call_operand.vmem [shape: bf16[2,81,8], index: 0, kind: input, shape index: {}]   ;;  %s1137_s1 = inlined_call_operand.vmem [shape: bf16[2,9,72], index: 1, kind: input, shape index: {}]   ;;  %s1138_s2 = inlined_call_operand.vmem [shape: bf16[8,36], index: 2, kind: input, shape index: {}]   ;;  %s1139_s3 = inlined_call_operand.vmem [shape: bf16[72,36], index: 3, kind: input, shape index: {}]   ;;  %s1140_s4 = inlined_call_operand.vmem [shape: f32[1,36], index: 4, kind: input, shape index: {}]   ;;  %s1141_s5 = inlined_call_operand.vmem [shape: bf16[2,9,36], index: 5, kind: output, shape index: {}]  }
   0x1 LB: > { %s794_s19 = sadd.s32 4294967295, %s944_s18   ;;  %p798_p0 = scmp.ge.s32.totalorder %s944_s18, 1  ;;  %s944_s18 = sphi %s978_s18, %s15_s18  }
   0x2   : > { %p197_p1 = scmp.lt.s32.totalorder %s944_s18, 3 }
   0x4   : > { %p198_p2 = pnand %p798_p0, %p197_p1 }
   0x5   : > { %v890_v0 = vld [vmem:[%s1139_s3] sm:$0xff] (!%p198_p2)   ;;  %v946_v1 = vmov (!%p198_p2), 0.0   ;;  %vm312_vm0 = vcmask (!%p198_p2), 1043456   ;;  %v891_v3 = vld [vmem:[%s1139_s3 + $0x8] sm:$0xff] (!%p198_p2)   ;;  %p230_p3 = scmp.lt.s32.totalorder (!%p198_p2), %s794_s19, 1  ;;  %v894_v5 = vld [vmem:[%s1139_s3 + $0x10] sm:$0xff] (!%p198_p2)  }
   0x6   : > { %201 = sbr.rel (%p198_p2) target bundleno = 315 (0x13b), region = 40  ;;  %864 = vmatprep.subr.bf16.mxu1 (!%p198_p2), %v946_v1  ;;  %v257_v2 = vld [vmem:[%s1138_s2] sm:$0xf] (!%p198_p2)  ;;  %vm947_vm1 = vmmov (!%p198_p2), 0   ;;  %vm293_vm2 = vcmask (!%p198_p2), 64512   ;;  %v895_v6 = vld [vmem:[%s1139_s3 + $0x18] sm:$0xff] (!%p198_p2)  }
   0x7   : > { %865 = vmatpush3.bf16.msra.mxu1 (!%p198_p2), %v890_v0  ;;  %878 = vmatprep.subr.msk.bf16.mxu0 (!%p198_p2), %vm312_vm0, %v257_v2  ;;  %v314_v4 = vsel (!%p198_p2), %vm312_vm0, %v257_v2, 0  ;;  %v898_v8 = vld [vmem:[%s1139_s3 + $0x20] ss:$0 sps:$4 sm:$0xff] (!%p198_p2)   ;;  %vm452_vm3 = vcmask (!%p198_p2), 588800   ;;  %vm396_vm4 = vcmask (!%p198_p2), 293888   ;;  %vm407_vm5 = vcmask (!%p198_p2), 286720  }
   0x8   : > { %866 = vmatprep.subr.bf16.mxu1 (!%p198_p2), %v946_v1  ;;  %851 = vmatpush3.bf16.msra.mxu0 (!%p198_p2), %v314_v4  ;;  %v457_v11 = vsel (!%p198_p2), %vm312_vm0, %v898_v8, 0  ;;  %v1028_v16 = vld [vmem:[%s1140_s4] ss:$0 sm:$0xff] (!%p198_p2)  ;;  %vm571_vm6 = vcmask (!%p198_p2), 287745   ;;  %vm572_vm7 = vsmask.f32 (!%p198_p2), 1280 }
   0x9   : > { %874 = vmatprep.mubr.msk.bf16.mxu1 (!%p198_p2), %vm947_vm1, %v946_v1  ;;  %vm521_vm8 = vsmask.f32 (!%p198_p2), 256  ;;  %vm573_vm9 = vmand (!%p198_p2), %vm571_vm6, %vm572_vm7  ;;  %vm597_vm11 = vsmask.f32 (!%p198_p2), 7942  ;;  %vm546_vm12 = vsmask.f32 (!%p198_p2), 7938 }
   0xa   : > { %vm1102_vm10 = vmand (!%p198_p2), %vm407_vm5, %vm521_vm8  ;;  %vm622_vm14 = vcmask (!%p198_p2), 288770   ;;  %vm623_vm15 = vsmask.f32 (!%p198_p2), 2304  ;;  %vm699_vm7 = vsmask.f32 (!%p198_p2), 7950 }
   0xb   : > { %867 = vmatpush3.bf16.msra.mxu1 (!%p198_p2), %v891_v3  ;;  %vm598_vm13 = vmand (!%p198_p2), %vm571_vm6, %vm597_vm11 }
   0xc   : > { %868 = vmatprep.subr.bf16.mxu1 (!%p198_p2), %v946_v1  ;;  %vm547_vm0 = vmand (!%p198_p2), %vm407_vm5, %vm546_vm12 }
   0xd   : > { %s1145_s19 = smov (!%p230_p3, %s794_s19), 1  ;;  %vm624_vm1 = vmand %vm622_vm14, %vm623_vm15 }
   0xe   : > { %s879_s26 = smul.u32 44, %s1145_s19  ;;  %s835_s29 = sshll.u32 %s1145_s19, 3 }
   0xf   : > { %s239_s7 = scalar_lea.vmem %s1137_s1, %s835_s29  ;;  %869 = vmatpush3.bf16.msra.mxu1 %v894_v5  ;;  %s1097_s21 = scalar_lea.vmem %s1141_s5, %s835_s29 }
  0x10   : > { %s234_s10 = scalar_lea.vmem %s1136_s0, %s879_s26  ;;  %870 = vmatprep.subr.bf16.mxu1 %v946_v1  ;;  %v899_v13 = vld [vmem:[%s239_s7] sm:$0x1f]  }
  0x11   : > { %v892_v7 = vld [vmem:[%s234_s10] sm:$0xff]   ;;  %v893_v9 = vld [vmem:[%s234_s10 + $0x8] sm:$0xff]   ;;  %v896_v10 = vld [vmem:[%s234_s10 + $0x10] sm:$0xff]  }
  0x12   : > { %852 = vmatprep.mubr.msk.bf16.mxu0 %vm293_vm2, %v892_v7  ;;  %v897_v12 = vld [vmem:[%s234_s10 + $0x18] sm:$0xff]   ;;  %v900_v14 = vld [vmem:[%s234_s10 + $0x20] sm:$0xff]   ;;  %v901_v15 = vld [vmem:[%s234_s10 + $0x28] ss:$0 sps:$4 sm:$0x11]  }
  0x13   : > { %853 = vmatmul.mubr.msk.bf16.vlgmr.msra.gmra.mrb[0].mxu0 %vm293_vm2, %v893_v9  ;;  %871 = vmatpush3.bf16.msra.mxu1 %v895_v6 }
  0x14   : > { %856 = vmatprep.mubr.msk.bf16.mxu0 %vm293_vm2, %v896_v10  ;;  %872 = vmatprep.subr.bf16.mxu1 %v946_v1 }
  0x17   : > { %873 = vmatpush3.bf16.msra.mxu1 %v457_v11 }
  0x1a   : > { %875 = vmatmul.mubr.msk.bf16.vlgmr.msra.gmra.mrb[0].mxu1 %vm452_vm3, %v899_v13  ;;  %vm674_vm3 = vsmask.f32 3328 }
  0x1b   : > { %857 = vmatmul.mubr.msk.bf16.gmra.mrb[4].mxu0 %vm293_vm2, %v897_v12 }
  0x1c   : > { %860 = vmatprep.mubr.msk.bf16.mxu0 %vm293_vm2, %v900_v14 }
  0x23   : > { %861 = vmatmul.mubr.msk.bf16.gmra.mrb[8].mxu0 %vm293_vm2, %v901_v15  ;;  %vm673_vm2 = vcmask 289795  }
  0x24   : > { %vm700_vm8 = vmand %vm673_vm2, %vm699_vm7 }
  0xe6   : > { %v854_v17 = vpop.f32.mrb[0].mxu0 }
  0xe7   : > { %v359_v18 = vadd.f32 %v854_v17, %v1028_v16  ;;  %v350_v19 = vpop.f32.mrb[1].mxu0 }
  0xe8   : > { %v351_v20 = vadd.f32 %v1028_v16, %v350_v19  ;;  %v855_v21 = vpop.f32.mrb[2].mxu0 }
  0xe9   : > { %399 = vst.msk [vmem:[#allocation2 + $0x10] sm:$0xff] %vm396_vm4, %v359_v18  ;;  %v362_v22 = vadd.f32 %v855_v21, %v1028_v16  ;;  %v353_v23 = vpop.f32.mrb[3].mxu0 }
  0xea   : > { %397 = vst.msk [vmem:[#allocation2] sm:$0xff] %vm396_vm4, %v351_v20  ;;  %v354_v24 = vadd.f32 %v1028_v16, %v353_v23 }
  0xeb   : > { %400 = vst.msk [vmem:[#allocation2 + $0x18] sm:$0xff] %vm396_vm4, %v362_v22 }
  0xec   : > { %398 = vst.msk [vmem:[#allocation2 + $0x8] sm:$0xff] %vm396_vm4, %v354_v24 }
  0xed   : > { %v1039_v28 = vpop.f32.mrb[0].mxu1 }
  0xee   : > { %v858_v25 = vpop.f32.mrb[4].mxu0  ;;  %v876_v31 = vpop.f32.mrb[1].mxu1 }
  0xef   : > { %v375_v26 = vadd.f32 %v858_v25, %v1028_v16  ;;  %v366_v27 = vpop.f32.mrb[5].mxu0  ;;  %v1044_v35 = vpop.f32.mrb[2].mxu1 }
  0xf0   : > { %v367_v29 = vadd.f32 %v1028_v16, %v366_v27  ;;  %v859_v30 = vpop.f32.mrb[6].mxu0  ;;  %v527_v36 = vld [vmem:[#allocation2 + $0x11] sm:$0x1]  ;;  %v877_v42 = vpop.f32.mrb[3].mxu1 }
  0xf1   : > { %403 = vst.msk [vmem:[#allocation2 + $0x30] sm:$0xff] %vm396_vm4, %v375_v26  ;;  %v378_v32 = vadd.f32 %v859_v30, %v1028_v16  ;;  %v369_v33 = vpop.f32.mrb[7].mxu0  ;;  %v500_v34 = vld [vmem:[#allocation2] sm:$0xff]  ;;  %v529_v40 = vadd.f32 %v527_v36, %v1044_v35 }
  0xf2   : > { %401 = vst.msk [vmem:[#allocation2 + $0x20] sm:$0xff] %vm396_vm4, %v367_v29  ;;  %v370_v37 = vadd.f32 %v1028_v16, %v369_v33  ;;  %v502_v38 = vadd.f32 %v500_v34, %v1039_v28  ;;  %v551_v39 = vld [vmem:[#allocation2 + $0x12] sm:$0xff]  ;;  %v552_v41 = vld [vmem:[#allocation2 + $0x1a] sm:$0x1] }
  0xf3   : > { %404 = vst.msk [vmem:[#allocation2 + $0x38] sm:$0xff] %vm396_vm4, %v378_v32  ;;  %v526_v43 = vld [vmem:[#allocation2 + $0x9] sm:$0xff]  ;;  %v553_v44 = vadd.f32 %v551_v39, %v1039_v28  ;;  %v501_v45 = vld [vmem:[#allocation2 + $0x8] sm:$0x1]  ;;  %v554_v46 = vadd.f32 %v552_v41, %v1044_v35  ;;  %v531_v49 = vsel %vm407_vm5, %v529_v40, -inf }
  0xf4   : > { %402 = vst.msk [vmem:[#allocation2 + $0x28] sm:$0xff] %vm396_vm4, %v370_v37  ;;  %v528_v47 = vadd.f32 %v526_v43, %v1039_v28  ;;  %v503_v48 = vadd.f32 %v501_v45, %v1044_v35  ;;  %v504_v52 = vsel %vm396_vm4, %v502_v38, -inf }
  0xf5   : > { %v555_v50 = vsel %vm396_vm4, %v553_v44, -inf  ;;  %v556_v51 = vsel %vm407_vm5, %v554_v46, -inf }
  0xf6   : > { %v530_v53 = vsel %vm396_vm4, %v528_v47, -inf  ;;  %v505_v54 = vsel %vm407_vm5, %v503_v48, -inf  ;;  %v557_v55 = vmax.f32 %v555_v50, %v556_v51  ;;  %v862_v56 = vpop.f32.mrb[8].mxu0 }
  0xf7   : > { %v506_v57 = vmax.f32 %v504_v52, %v505_v54  ;;  %v532_v58 = vmax.f32 %v530_v53, %v531_v49  ;;  %v391_v59 = vadd.f32 %v862_v56, %v1028_v16  ;;  %v382_v60 = vpop.f32.mrb[9].mxu0 }
  0xf8   : > { %v558_v61 = vrot.slane %v557_v55, 4  ;;  %v629_v62 = vld [vmem:[#allocation2 + $0x35] sm:$0x1]  ;;  %v383_v63 = vadd.f32 %v1028_v16, %v382_v60  ;;  %v863_v0 = vpop.f32.mrb[10].mxu0 }
  0xf9   : > { %v577_v1 = vld [vmem:[#allocation2 + $0x1b] sm:$0xff]  ;;  %v507_v2 = vrot.slane %v506_v57, 4  ;;  %v533_v3 = vrot.slane %v532_v58, 4  ;;  %v578_v4 = vld [vmem:[#allocation2 + $0x23] sm:$0x1]  ;;  %v631_v5 = vadd.f32 %v629_v62, %v1044_v35  ;;  %v385_v6 = vpop.f32.mrb[11].mxu0 }
  0xfa   : > { %408 = vst.msk [vmem:[#allocation2 + $0x50] sm:$0x1] %vm407_vm5, %v391_v59  ;;  %v579_v7 = vadd.f32 %v577_v1, %v1039_v28  ;;  %v653_v8 = vld [vmem:[#allocation2 + $0x36] sm:$0xff]  ;;  %v559_v9 = vmax.f32 %v557_v55, %v558_v61  ;;  %v580_v10 = vadd.f32 %v578_v4, %v1044_v35  ;;  %v386_v11 = vadd.f32 %v1028_v16, %v385_v6  ;;  %v654_v26 = vld [vmem:[#allocation2 + $0x3e] sm:$0x1] }
  0xfb   : > { %405 = vst.msk [vmem:[#allocation2 + $0x40] sm:$0xff] %vm396_vm4, %v383_v63  ;;  %v602_v12 = vld [vmem:[#allocation2 + $0x24] sm:$0xff]  ;;  %v628_v13 = vld [vmem:[#allocation2 + $0x2d] sm:$0xff]  ;;  %v655_v14 = vadd.f32 %v653_v8, %v1039_v28  ;;  %v508_v15 = vmax.f32 %v506_v57, %v507_v2  ;;  %v534_v17 = vmax.f32 %v532_v58, %v533_v3  ;;  %v603_v22 = vld [vmem:[#allocation2 + $0x2c] sm:$0x1]  ;;  %v633_v25 = vsel %vm407_vm5, %v631_v5, -inf }
  0xfc   : > { %v581_v18 = vsel %vm396_vm4, %v579_v7, -inf  ;;  %v604_v19 = vadd.f32 %v602_v12, %v1039_v28  ;;  %v630_v20 = vadd.f32 %v628_v13, %v1039_v28  ;;  %v560_v21 = vrot.slane %v559_v9, 2  ;;  %406 = vst.msk [vmem:[#allocation2 + $0x48] sm:$0xff] %vm396_vm4, %v386_v11 }
  0xfd   : > { %v509_v23 = vrot.slane %v508_v15, 2  ;;  %v535_v24 = vrot.slane %v534_v17, 2  ;;  %v582_v16 = vsel %vm407_vm5, %v580_v10, -inf  ;;  %v605_v34 = vadd.f32 %v603_v22, %v1044_v35 }
  0xfe   : > { %v606_v27 = vsel %vm396_vm4, %v604_v19, -inf  ;;  %v632_v29 = vsel %vm396_vm4, %v630_v20, -inf  ;;  %v561_v30 = vmax.f32 %v559_v9, %v560_v21  ;;  %v583_v31 = vmax.f32 %v581_v18, %v582_v16 }
  0xff   : > { %v510_v32 = vmax.f32 %v508_v15, %v509_v23  ;;  %v536_v33 = vmax.f32 %v534_v17, %v535_v24  ;;  %v634_v36 = vmax.f32 %v632_v29, %v633_v25  ;;  %v657_v37 = vsel %vm396_vm4, %v655_v14, -inf }
 0x100   : > { %v562_v38 = vrot.slane %v561_v30, 1  ;;  %v584_v39 = vrot.slane %v583_v31, 4  ;;  %v656_v40 = vadd.f32 %v654_v26, %v1044_v35  ;;  %v607_v43 = vsel %vm407_vm5, %v605_v34, -inf }
 0x101   : > { %v511_v41 = vrot.slane %v510_v32, 1  ;;  %v537_v42 = vrot.slane %v536_v33, 1  ;;  %v635_v44 = vrot.slane %v634_v36, 4  ;;  %v608_v47 = vmax.f32 %v606_v27, %v607_v43  ;;  %v705_v53 = vld [vmem:[#allocation2 + $0x50] sm:$0x1] }
 0x102   : > { %v563_v45 = vmax.f32 %v561_v30, %v562_v38  ;;  %v585_v46 = vmax.f32 %v583_v31, %v584_v39  ;;  %v658_v48 = vsel %vm407_vm5, %v656_v40, -inf  ;;  %v679_v54 = vld [vmem:[#allocation2 + $0x3f] sm:$0xff]  ;;  %v680_v58 = vld [vmem:[#allocation2 + $0x47] sm:$0x1]  ;;  %v707_v1 = vadd.f32 %v705_v53, %v1044_v35 }
 0x103   : > { %v512_v49 = vmax.f32 %v510_v32, %v511_v41  ;;  %v538_v50 = vmax.f32 %v536_v33, %v537_v42  ;;  %v636_v51 = vmax.f32 %v634_v36, %v635_v44  ;;  %v659_v52 = vmax.f32 %v657_v37, %v658_v48  ;;  %v704_v2 = vld [vmem:[#allocation2 + $0x48] sm:$0xff] }
 0x104   : > { %v826_v55 = vmul.f32 -1.442695, %v563_v45  ;;  %v586_v56 = vrot.slane %v585_v46, 2  ;;  %v609_v57 = vrot.slane %v608_v47, 4  ;;  %v681_v5 = vadd.f32 %v679_v54, %v1039_v28  ;;  %v574_v54 = vld [vmem:[%s1097_s21] sm:$0x2] }
 0x105   : > { %v824_v59 = vmul.f32 -1.442695, %v512_v49  ;;  %v825_v60 = vmul.f32 -1.442695, %v538_v50  ;;  %v637_v61 = vrot.slane %v636_v51, 2  ;;  %v660_v62 = vrot.slane %v659_v52, 4 }
 0x106   : > { %902 = vpow2.f32 %v826_v55  ;;  %v587_v63 = vmax.f32 %v585_v46, %v586_v56  ;;  %v610_v0 = vmax.f32 %v608_v47, %v609_v57  ;;  %v682_v8 = vadd.f32 %v680_v58, %v1044_v35  ;;  %v523_v58 = vld [vmem:[%s1097_s21] sm:$0x1] }
 0x107   : > { %904 = vpow2.f32 %v824_v59  ;;  %v638_v3 = vmax.f32 %v636_v51, %v637_v61  ;;  %v661_v4 = vmax.f32 %v659_v52, %v660_v62  ;;  %v683_v11 = vsel %vm396_vm4, %v681_v5, -inf }
 0x108   : > { %906 = vpow2.f32 %v825_v60  ;;  %v588_v6 = vrot.slane %v587_v63, 1  ;;  %v611_v7 = vrot.slane %v610_v0, 2  ;;  %v706_v12 = vadd.f32 %v704_v2, %v1039_v28 }
 0x109   : > { %v639_v9 = vrot.slane %v638_v3, 1  ;;  %v662_v10 = vrot.slane %v661_v4, 2  ;;  %v684_v15 = vsel %vm407_vm5, %v682_v8, -inf  ;;  %v709_v18 = vsel %vm407_vm5, %v707_v1, -inf }
 0x10a   : > { %v589_v13 = vmax.f32 %v587_v63, %v588_v6  ;;  %v612_v14 = vmax.f32 %v610_v0, %v611_v7  ;;  %v685_v19 = vmax.f32 %v683_v11, %v684_v15  ;;  %v708_v20 = vsel %vm396_vm4, %v706_v12, -inf  ;;  %vm675_vm4 = vmand %vm673_vm2, %vm674_vm3 }
 0x10b   : > { %v663_v17 = vmax.f32 %v661_v4, %v662_v10  ;;  %v710_v23 = vmax.f32 %v708_v20, %v709_v18  ;;  %v640_v35 = vmax.f32 %v638_v3, %v639_v9  ;;  %vm648_vm5 = vsmask.f32 7946 }
 0x10c   : > { %v827_v21 = vmul.f32 -1.442695, %v589_v13  ;;  %v613_v22 = vrot.slane %v612_v14, 1  ;;  %v686_v16 = vrot.slane %v685_v19, 4  ;;  %vm649_vm6 = vmand %vm622_vm14, %vm648_vm5 }
 0x10d   : > { %v664_v24 = vrot.slane %v663_v17, 1  ;;  %v711_v26 = vrot.slane %v710_v23, 4  ;;  %v829_v34 = vmul.f32 -1.442695, %v640_v35 }
 0x10e   : > { %908 = vpow2.f32 %v827_v21  ;;  %v614_v25 = vmax.f32 %v612_v14, %v613_v22  ;;  %v687_v27 = vmax.f32 %v685_v19, %v686_v16  ;;  %v625_v14 = vld [vmem:[%s1097_s21] sm:$0x4]  ;;  %v676_v21 = vld [vmem:[%s1097_s21] sm:$0x8] }
 0x10f   : > { %v665_v28 = vmax.f32 %v663_v17, %v664_v24  ;;  %v712_v31 = vmax.f32 %v710_v23, %v711_v26 }
 0x110   : > { %v903_v29 = vpop.eup %902  ;;  %v828_v30 = vmul.f32 -1.442695, %v614_v25  ;;  %v688_v36 = vrot.slane %v687_v27, 2 }
 0x111   : > { %v905_v32 = vpop.eup %904  ;;  %v567_v33 = vadd.f32 1.0, %v903_v29  ;;  %v830_v39 = vmul.f32 -1.442695, %v665_v28  ;;  %v713_v40 = vrot.slane %v712_v31, 2 }
 0x112   : > { %v907_v37 = vpop.eup %906  ;;  %v516_v38 = vadd.f32 1.0, %v905_v32  ;;  %910 = vpow2.f32 %v828_v30  ;;  %v689_v41 = vmax.f32 %v687_v27, %v688_v36  ;;  %v724_v27 = vld [vmem:[%s1097_s21 + $0x4] sm:$0x1] }
 0x113   : > { %912 = vrcp.f32 %v567_v33  ;;  %v714_v42 = vmax.f32 %v712_v31, %v713_v40  ;;  %v542_v44 = vadd.f32 1.0, %v907_v37 }
 0x114   : > { %914 = vrcp.f32 %v516_v38  ;;  %v690_v43 = vrot.slane %v689_v41, 1 }
 0x115   : > { %916 = vpow2.f32 %v829_v34  ;;  %v715_v45 = vrot.slane %v714_v42, 1 }
 0x116   : > { %918 = vpow2.f32 %v830_v39  ;;  %v691_v46 = vmax.f32 %v689_v41, %v690_v43 }
 0x117   : > { %v716_v48 = vmax.f32 %v714_v42, %v715_v45  ;;  %920 = vrcp.f32 %v542_v44 }
 0x118   : > { %v909_v47 = vpop.eup %908  ;;  %v831_v50 = vmul.f32 -1.442695, %v691_v46 }
 0x119   : > { %v593_v49 = vadd.f32 1.0, %v909_v47  ;;  %v832_v51 = vmul.f32 -1.442695, %v716_v48 }
 0x11b   : > { %922 = vrcp.f32 %v593_v49 }
 0x11c   : > { %v911_v52 = vpop.eup %910  ;;  %924 = vpow2.f32 %v831_v50 }
 0x11d   : > { %v913_v53 = vpop.eup %912  ;;  %v618_v55 = vadd.f32 1.0, %v911_v52  ;;  %926 = vpow2.f32 %v832_v51 }
 0x11e   : > { %v915_v56 = vpop.eup %914  ;;  %v570_v59 = vpack.c.bf16 %v913_v53, %v913_v53 }
 0x11f   : > { %v917_v60 = vpop.eup %916  ;;  %v519_v61 = vpack.c.bf16 %v915_v56, %v915_v56  ;;  %928 = vrcp.f32 %v618_v55 }
 0x120   : > { %v919_v62 = vpop.eup %918  ;;  %v575_v63 = vsel %vm573_vm9, %v570_v59, %v574_v54  ;;  %v644_v2 = vadd.f32 1.0, %v917_v60 }
 0x121   : > { %v524_v0 = vsel %vm1102_vm10, %v519_v61, %v523_v58  ;;  %576 = vst [vmem:[%s1097_s21] sm:$0x2] %v575_v63  ;;  %v669_v1 = vadd.f32 1.0, %v919_v62  ;;  %v921_v3 = vpop.eup %920 }
 0x122   : > { %525 = vst [vmem:[%s1097_s21] sm:$0x1] %v524_v0  ;;  %v545_v8 = vpack.c.bf16 %v921_v3, %v921_v3 }
 0x123   : > { %930 = vrcp.f32 %v669_v1 }
 0x124   : > { %932 = vrcp.f32 %v644_v2 }
 0x125   : > { %v923_v4 = vpop.eup %922 }
 0x126   : > { %v925_v5 = vpop.eup %924  ;;  %v596_v6 = vpack.c.bf16 %v923_v4, %v923_v4 }
 0x127   : > { %v927_v7 = vpop.eup %926  ;;  %v695_v10 = vadd.f32 1.0, %v925_v5 }
 0x128   : > { %v599_v9 = vld [vmem:[%s1097_s21] sm:$0x2]  ;;  %v720_v15 = vadd.f32 1.0, %v927_v7 }
 0x129   : > { %v929_v11 = vpop.eup %928  ;;  %v548_v12 = vld [vmem:[%s1097_s21] sm:$0x1]  ;;  %v600_v13 = vsel %vm598_vm13, %v596_v6, %v599_v9  ;;  %934 = vrcp.f32 %v695_v10 }
 0x12a   : > { %v549_v17 = vsel %vm547_vm0, %v545_v8, %v548_v12  ;;  %601 = vst [vmem:[%s1097_s21] sm:$0x2] %v600_v13  ;;  %v621_v18 = vpack.c.bf16 %v929_v11, %v929_v11  ;;  %936 = vrcp.f32 %v720_v15 }
 0x12b   : > { %550 = vst [vmem:[%s1097_s21] sm:$0x1] %v549_v17 }
 0x12c   : > { %v626_v19 = vsel %vm624_vm1, %v621_v18, %v625_v14 }
 0x12d   : > { %v931_v20 = vpop.eup %930  ;;  %627 = vst [vmem:[%s1097_s21] sm:$0x4] %v626_v19 }
 0x12e   : > { %v672_v22 = vpack.c.bf16 %v931_v20, %v931_v20  ;;  %v933_v23 = vpop.eup %932 }
 0x12f   : > { %v647_v24 = vpack.c.bf16 %v933_v23, %v933_v23 }
 0x130   : > { %v677_v35 = vsel %vm675_vm4, %v672_v22, %v676_v21 }
 0x131   : > { %678 = vst [vmem:[%s1097_s21] sm:$0x8] %v677_v35 }
 0x133   : > { %v935_v16 = vpop.eup %934 }
 0x134   : > { %v650_v25 = vld [vmem:[%s1097_s21] sm:$0x4]  ;;  %v937_v26 = vpop.eup %936  ;;  %v698_v30 = vpack.c.bf16 %v935_v16, %v935_v16 }
 0x135   : > { %v651_v28 = vsel %vm649_vm6, %v647_v24, %v650_v25  ;;  %v723_v29 = vpack.c.bf16 %v937_v26, %v937_v26 }
 0x136   : > { %652 = vst [vmem:[%s1097_s21] sm:$0x4] %v651_v28 }
 0x137   : > { %v725_v32 = vsel %vm1102_vm10, %v723_v29, %v724_v27 }
 0x138   : > { %v701_v31 = vld [vmem:[%s1097_s21] sm:$0x8]  ;;  %726 = vst [vmem:[%s1097_s21 + $0x4] sm:$0x1] %v725_v32 }
 0x139   : > { %v702_v33 = vsel %vm700_vm8, %v698_v30, %v701_v31 }
 0x13a   : > { %703 = vst [vmem:[%s1097_s21] sm:$0x8] %v702_v33 }
 0x13b PF: > { %s15_s18 = sadd.s32 1, %s944_s18  }
 0x13c   : > { %p12_p4 = scmp.ge.s32.totalorder %s15_s18, 4  }
 0x13e   :  { %14 = sbr.rel (!%p12_p4) target bundleno = 1 (0x1), region = 73 }

// kernel: tlm_dp2d_forward.5
= control target key start
LH: loop header
LB: loop body
LE: loop exit
PB: predicated region body
PF: predicated region fallthrough
CT: control target
= control target key end

     0   :  { %vm152_vm0 = vcmask 1043456   ;;  %vm363_vm1 = vcmask 1041408   ;;  %v956_v0 = vmov 0.0   ;;  %vm957_vm2 = vmmov 0   ;;  %s1217_s3 = inlined_call_operand.vmem [shape: bf16[8,128], index: 3, kind: input, shape index: {}]   ;;  %s1218_s2 = inlined_call_operand.vmem [shape: bf16[4,128], index: 2, kind: input, shape index: {}]   ;;  %s1219_s1 = inlined_call_operand.vmem [shape: bf16[168,8], index: 1, kind: input, shape index: {}]   ;;  %s1220_s0 = inlined_call_operand.vmem [shape: bf16[168,4], index: 0, kind: input, shape index: {}]   ;;  %s1221_s4 = inlined_call_operand.vmem [shape: f32[1,128], index: 4, kind: input, shape index: {}]   ;;  %s1222_s5 = inlined_call_operand.vmem [shape: f32[168,128], index: 5, kind: output, shape index: {}]  }
   0x1   :  { %756 = vmatprep.subr.bf16.mxu0 %v956_v0  ;;  %802 = vmatprep.subr.bf16.mxu1 %v956_v0  ;;  %v64_v1 = vld [vmem:[%s1217_s3] sm:$0xf]  ;;  %vm118_vm3 = vcmask 64512   ;;  %vm329_vm4 = vcmask 31744   ;;  %v852_v7 = vld [vmem:[%s1219_s1 + $0x8] sm:$0xff]   ;;  %v854_v9 = vld [vmem:[%s1219_s1 + $0x10] sm:$0xff]  }
   0x2   :  { %v42_v2 = vld [vmem:[%s1218_s2] sm:$0x3]  ;;  %v154_v3 = vsel %vm152_vm0, %v64_v1, 0  ;;  %758 = vmatprep.mubr.msk.bf16.mxu0 %vm957_vm2, %v956_v0  ;;  %804 = vmatprep.mubr.msk.bf16.mxu1 %vm957_vm2, %v956_v0  ;;  %v853_v8 = vld [vmem:[%s1220_s0 + $0x8] sm:$0xff]   ;;  %v855_v10 = vld [vmem:[%s1220_s0 + $0x10] sm:$0xff]  }
   0x3   :  { %v365_v4 = vsel %vm363_vm1, %v42_v2, 0  ;;  %v850_v5 = vld [vmem:[%s1219_s1] sm:$0xff]   ;;  %757 = vmatpush3.bf16.msra.mxu0 %v154_v3  ;;  %v856_v11 = vld [vmem:[%s1219_s1 + $0x18] sm:$0xff]   ;;  %v860_v15 = vld [vmem:[%s1219_s1 + $0x28] sm:$0xff]  }
   0x4   :  { %803 = vmatpush3.bf16.msra.mxu1 %v365_v4  ;;  %v851_v6 = vld [vmem:[%s1220_s0] sm:$0xff]   ;;  %v857_v12 = vld [vmem:[%s1220_s0 + $0x18] sm:$0xff]   ;;  %v861_v16 = vld [vmem:[%s1220_s0 + $0x28] sm:$0xff]  }
   0x5   :  { %v858_v13 = vld [vmem:[%s1219_s1 + $0x20] sm:$0xff]   ;;  %v862_v17 = vld [vmem:[%s1219_s1 + $0x30] sm:$0xff]   ;;  %v864_v19 = vld [vmem:[%s1219_s1 + $0x38] sm:$0xff]  }
   0x6   :  { %759 = vmatmul.mubr.msk.bf16.vlgmr.msra.gmra.mrb[0].mxu0 %vm118_vm3, %v850_v5  ;;  %v859_v14 = vld [vmem:[%s1220_s0 + $0x20] sm:$0xff]   ;;  %v863_v18 = vld [vmem:[%s1220_s0 + $0x30] sm:$0xff]   ;;  %v865_v20 = vld [vmem:[%s1220_s0 + $0x38] sm:$0xff]  }
   0x7   :  { %805 = vmatmul.mubr.msk.bf16.vlgmr.msra.gmra.mrb[0].mxu1 %vm329_vm4, %v851_v6  ;;  %762 = vmatprep.mubr.msk.bf16.mxu0 %vm957_vm2, %v956_v0  ;;  %v866_v21 = vld [vmem:[%s1219_s1 + $0x40] sm:$0xff]   ;;  %v868_v23 = vld [vmem:[%s1219_s1 + $0x48] sm:$0xff]   ;;  %v870_v25 = vld [vmem:[%s1219_s1 + $0x50] ss:$0 sps:$4 sm:$0xff]  }
   0x8   :  { %808 = vmatprep.mubr.msk.bf16.mxu1 %vm957_vm2, %v956_v0  ;;  %v867_v22 = vld [vmem:[%s1220_s0 + $0x40] sm:$0xff]   ;;  %v869_v24 = vld [vmem:[%s1220_s0 + $0x48] sm:$0xff]   ;;  %v871_v26 = vld [vmem:[%s1220_s0 + $0x50] ss:$0 sps:$4 sm:$0xff]  }
   0x9   :  { %v1131_v29 = vld [vmem:[%s1221_s4] ss:$0 sm:$0xff] }
   0xe   :  { %763 = vmatmul.mubr.msk.bf16.gmra.mrb[4].mxu0 %vm118_vm3, %v852_v7 }
   0xf   :  { %809 = vmatmul.mubr.msk.bf16.gmra.mrb[4].mxu1 %vm329_vm4, %v853_v8  ;;  %766 = vmatprep.mubr.msk.bf16.mxu0 %vm957_vm2, %v956_v0 }
  0x10   :  { %812 = vmatprep.mubr.msk.bf16.mxu1 %vm957_vm2, %v956_v0 }
  0x16   :  { %767 = vmatmul.mubr.msk.bf16.gmra.mrb[8].mxu0 %vm118_vm3, %v854_v9 }
  0x17   :  { %813 = vmatmul.mubr.msk.bf16.gmra.mrb[8].mxu1 %vm329_vm4, %v855_v10  ;;  %770 = vmatprep.mubr.msk.bf16.mxu0 %vm957_vm2, %v956_v0 }
  0x18   :  { %816 = vmatprep.mubr.msk.bf16.mxu1 %vm957_vm2, %v956_v0 }
  0x1e   :  { %771 = vmatmul.mubr.msk.bf16.gmra.mrb[12].mxu0 %vm118_vm3, %v856_v11 }
  0x1f   :  { %817 = vmatmul.mubr.msk.bf16.gmra.mrb[12].mxu1 %vm329_vm4, %v857_v12  ;;  %774 = vmatprep.mubr.msk.bf16.mxu0 %vm957_vm2, %v956_v0 }
  0x20   :  { %820 = vmatprep.mubr.msk.bf16.mxu1 %vm957_vm2, %v956_v0 }
  0x26   :  { %775 = vmatmul.mubr.msk.bf16.gmra.mrb[16].mxu0 %vm118_vm3, %v858_v13 }
  0x27   :  { %821 = vmatmul.mubr.msk.bf16.gmra.mrb[16].mxu1 %vm329_vm4, %v859_v14  ;;  %778 = vmatprep.mubr.msk.bf16.mxu0 %vm957_vm2, %v956_v0 }
  0x28   :  { %824 = vmatprep.mubr.msk.bf16.mxu1 %vm957_vm2, %v956_v0 }
  0x2e   :  { %779 = vmatmul.mubr.msk.bf16.gmra.mrb[20].mxu0 %vm118_vm3, %v860_v15 }
  0x2f   :  { %825 = vmatmul.mubr.msk.bf16.gmra.mrb[20].mxu1 %vm329_vm4, %v861_v16  ;;  %782 = vmatprep.mubr.msk.bf16.mxu0 %vm957_vm2, %v956_v0 }
  0x30   :  { %828 = vmatprep.mubr.msk.bf16.mxu1 %vm957_vm2, %v956_v0 }
  0x36   :  { %783 = vmatmul.mubr.msk.bf16.gmra.mrb[24].mxu0 %vm118_vm3, %v862_v17 }
  0x37   :  { %829 = vmatmul.mubr.msk.bf16.gmra.mrb[24].mxu1 %vm329_vm4, %v863_v18  ;;  %786 = vmatprep.mubr.msk.bf16.mxu0 %vm957_vm2, %v956_v0 }
  0x38   :  { %832 = vmatprep.mubr.msk.bf16.mxu1 %vm957_vm2, %v956_v0 }
  0x3e   :  { %787 = vmatmul.mubr.msk.bf16.gmra.mrb[28].mxu0 %vm118_vm3, %v864_v19 }
  0x3f   :  { %833 = vmatmul.mubr.msk.bf16.gmra.mrb[28].mxu1 %vm329_vm4, %v865_v20  ;;  %790 = vmatprep.mubr.msk.bf16.mxu0 %vm957_vm2, %v956_v0 }
  0x40   :  { %836 = vmatprep.mubr.msk.bf16.mxu1 %vm957_vm2, %v956_v0 }
  0x46   :  { %791 = vmatmul.mubr.msk.bf16.gmra.mrb[32].mxu0 %vm118_vm3, %v866_v21 }
  0x47   :  { %837 = vmatmul.mubr.msk.bf16.gmra.mrb[32].mxu1 %vm329_vm4, %v867_v22  ;;  %794 = vmatprep.mubr.msk.bf16.mxu0 %vm957_vm2, %v956_v0 }
  0x48   :  { %840 = vmatprep.mubr.msk.bf16.mxu1 %vm957_vm2, %v956_v0 }
  0x4e   :  { %795 = vmatmul.mubr.msk.bf16.gmra.mrb[36].mxu0 %vm118_vm3, %v868_v23 }
  0x4f   :  { %841 = vmatmul.mubr.msk.bf16.gmra.mrb[36].mxu1 %vm329_vm4, %v869_v24  ;;  %798 = vmatprep.mubr.msk.bf16.mxu0 %vm957_vm2, %v956_v0 }
  0x50   :  { %844 = vmatprep.mubr.msk.bf16.mxu1 %vm957_vm2, %v956_v0 }
  0x56   :  { %799 = vmatmul.mubr.msk.bf16.gmra.mrb[40].mxu0 %vm118_vm3, %v870_v25 }
  0x57   :  { %845 = vmatmul.mubr.msk.bf16.gmra.mrb[40].mxu1 %vm329_vm4, %v871_v26 }
  0xd9   :  { %v190_v27 = vpop.f32.mrb[0].mxu0 }
  0xda   :  { %v401_v28 = vpop.f32.mrb[0].mxu1  ;;  %v760_v31 = vpop.f32.mrb[1].mxu0 }
  0xdb   :  { %v402_v30 = vadd.f32 %v401_v28, %v190_v27  ;;  %v806_v32 = vpop.f32.mrb[1].mxu1  ;;  %v193_v33 = vpop.f32.mrb[2].mxu0 }
  0xdc   :  { %v404_v34 = vpop.f32.mrb[2].mxu1  ;;  %v761_v37 = vpop.f32.mrb[3].mxu0 }
  0xdd   :  { %v494_v35 = vadd.f32 %v1131_v29, %v402_v30  ;;  %v405_v36 = vadd.f32 %v404_v34, %v193_v33  ;;  %v807_v38 = vpop.f32.mrb[3].mxu1 }
  0xdf   :  { %v711_v39 = vmul.f32 -1.442695, %v494_v35  ;;  %v495_v40 = vadd.f32 %v1131_v29, %v405_v36 }
  0xe1   :  { %872 = vpow2.f32 %v711_v39  ;;  %v712_v41 = vmul.f32 -1.442695, %v495_v40  ;;  %v198_v42 = vpop.f32.mrb[4].mxu0 }
  0xe2   :  { %v409_v43 = vpop.f32.mrb[4].mxu1  ;;  %v764_v45 = vpop.f32.mrb[5].mxu0 }
  0xe3   :  { %874 = vpow2.f32 %v712_v41  ;;  %v410_v44 = vadd.f32 %v409_v43, %v198_v42  ;;  %v810_v46 = vpop.f32.mrb[5].mxu1  ;;  %v201_v47 = vpop.f32.mrb[6].mxu0 }
  0xe4   :  { %v412_v48 = vpop.f32.mrb[6].mxu1  ;;  %v765_v51 = vpop.f32.mrb[7].mxu0 }
  0xe5   :  { %v496_v49 = vadd.f32 %v1131_v29, %v410_v44  ;;  %v413_v50 = vadd.f32 %v412_v48, %v201_v47  ;;  %v811_v52 = vpop.f32.mrb[7].mxu1 }
  0xe7   :  { %v713_v53 = vmul.f32 -1.442695, %v496_v49  ;;  %v497_v54 = vadd.f32 %v1131_v29, %v413_v50 }
  0xe9   :  { %876 = vpow2.f32 %v713_v53  ;;  %v714_v55 = vmul.f32 -1.442695, %v497_v54  ;;  %v206_v56 = vpop.f32.mrb[8].mxu0 }
  0xea   :  { %v417_v57 = vpop.f32.mrb[8].mxu1  ;;  %v768_v60 = vpop.f32.mrb[9].mxu0 }
  0xeb   :  { %v873_v58 = vpop.eup %872  ;;  %878 = vpow2.f32 %v714_v55  ;;  %v418_v59 = vadd.f32 %v417_v57, %v206_v56  ;;  %v814_v61 = vpop.f32.mrb[9].mxu1 }
  0xec   :  { %v578_v62 = vadd.f32 1.0, %v873_v58  ;;  %v209_v63 = vpop.f32.mrb[10].mxu0  ;;  %v420_v0 = vpop.f32.mrb[10].mxu1 }
  0xed   :  { %v875_v1 = vpop.eup %874  ;;  %v498_v2 = vadd.f32 %v1131_v29, %v418_v59  ;;  %v421_v3 = vadd.f32 %v420_v0, %v209_v63  ;;  %v769_v4 = vpop.f32.mrb[11].mxu0 }
  0xee   :  { %v815_v5 = vpop.f32.mrb[11].mxu1  ;;  %880 = vrcp.f32 %v578_v62  ;;  %v579_v6 = vadd.f32 1.0, %v875_v1 }
  0xef   :  { %v715_v7 = vmul.f32 -1.442695, %v498_v2  ;;  %v499_v8 = vadd.f32 %v1131_v29, %v421_v3 }
  0xf0   :  { %882 = vrcp.f32 %v579_v6 }
  0xf1   :  { %884 = vpow2.f32 %v715_v7  ;;  %v716_v9 = vmul.f32 -1.442695, %v499_v8  ;;  %v214_v10 = vpop.f32.mrb[12].mxu0 }
  0xf2   :  { %v425_v11 = vpop.f32.mrb[12].mxu1  ;;  %v772_v14 = vpop.f32.mrb[13].mxu0 }
  0xf3   :  { %v877_v12 = vpop.eup %876  ;;  %886 = vpow2.f32 %v716_v9  ;;  %v426_v13 = vadd.f32 %v425_v11, %v214_v10  ;;  %v818_v15 = vpop.f32.mrb[13].mxu1 }
  0xf4   :  { %v580_v16 = vadd.f32 1.0, %v877_v12  ;;  %v217_v17 = vpop.f32.mrb[14].mxu0  ;;  %v428_v18 = vpop.f32.mrb[14].mxu1 }
  0xf5   :  { %v879_v19 = vpop.eup %878  ;;  %v500_v20 = vadd.f32 %v1131_v29, %v426_v13  ;;  %v429_v21 = vadd.f32 %v428_v18, %v217_v17  ;;  %v773_v22 = vpop.f32.mrb[15].mxu0 }
  0xf6   :  { %v819_v23 = vpop.f32.mrb[15].mxu1  ;;  %888 = vrcp.f32 %v580_v16  ;;  %v581_v24 = vadd.f32 1.0, %v879_v19 }
  0xf7   :  { %v717_v25 = vmul.f32 -1.442695, %v500_v20  ;;  %v501_v26 = vadd.f32 %v1131_v29, %v429_v21 }
  0xf8   :  { %v881_v27 = vpop.eup %880  ;;  %890 = vrcp.f32 %v581_v24 }
  0xf9   :  { %641 = vst [vmem:[%s1222_s5] sm:$0xff] %v881_v27  ;;  %892 = vpow2.f32 %v717_v25  ;;  %v718_v28 = vmul.f32 -1.442695, %v501_v26  ;;  %v222_v31 = vpop.f32.mrb[16].mxu0 }
  0xfa   :  { %v883_v30 = vpop.eup %882  ;;  %v433_v32 = vpop.f32.mrb[16].mxu1 }
  0xfb   :  { %v885_v33 = vpop.eup %884  ;;  %642 = vst [vmem:[%s1222_s5 + $0x8] sm:$0xff] %v883_v30  ;;  %894 = vpow2.f32 %v718_v28  ;;  %v434_v34 = vadd.f32 %v433_v32, %v222_v31  ;;  %v776_v35 = vpop.f32.mrb[17].mxu0 }
  0xfc   :  { %v822_v36 = vpop.f32.mrb[17].mxu1  ;;  %v582_v37 = vadd.f32 1.0, %v885_v33  ;;  %v225_v38 = vpop.f32.mrb[18].mxu0 }
  0xfd   :  { %v436_v39 = vpop.f32.mrb[18].mxu1  ;;  %v887_v40 = vpop.eup %886  ;;  %v502_v41 = vadd.f32 %v1131_v29, %v434_v34 }
  0xfe   :  { %v437_v42 = vadd.f32 %v436_v39, %v225_v38  ;;  %v777_v43 = vpop.f32.mrb[19].mxu0  ;;  %v823_v44 = vpop.f32.mrb[19].mxu1  ;;  %896 = vrcp.f32 %v582_v37  ;;  %v583_v45 = vadd.f32 1.0, %v887_v40 }
  0xff   :  { %v719_v46 = vmul.f32 -1.442695, %v502_v41 }
 0x100   :  { %v503_v47 = vadd.f32 %v1131_v29, %v437_v42  ;;  %v889_v48 = vpop.eup %888  ;;  %898 = vrcp.f32 %v583_v45 }
 0x101   :  { %643 = vst [vmem:[%s1222_s5 + $0x10] sm:$0xff] %v889_v48  ;;  %900 = vpow2.f32 %v719_v46  ;;  %v230_v51 = vpop.f32.mrb[20].mxu0 }
 0x102   :  { %v720_v49 = vmul.f32 -1.442695, %v503_v47  ;;  %v891_v50 = vpop.eup %890  ;;  %v441_v52 = vpop.f32.mrb[20].mxu1 }
 0x103   :  { %v893_v53 = vpop.eup %892  ;;  %644 = vst [vmem:[%s1222_s5 + $0x18] sm:$0xff] %v891_v50  ;;  %v442_v54 = vadd.f32 %v441_v52, %v230_v51  ;;  %v780_v55 = vpop.f32.mrb[21].mxu0 }
 0x104   :  { %902 = vpow2.f32 %v720_v49  ;;  %v826_v56 = vpop.f32.mrb[21].mxu1  ;;  %v584_v57 = vadd.f32 1.0, %v893_v53  ;;  %v233_v58 = vpop.f32.mrb[22].mxu0 }
 0x105   :  { %v444_v59 = vpop.f32.mrb[22].mxu1  ;;  %v895_v60 = vpop.eup %894  ;;  %v504_v61 = vadd.f32 %v1131_v29, %v442_v54 }
 0x106   :  { %v445_v62 = vadd.f32 %v444_v59, %v233_v58  ;;  %v781_v63 = vpop.f32.mrb[23].mxu0  ;;  %v827_v0 = vpop.f32.mrb[23].mxu1  ;;  %904 = vrcp.f32 %v584_v57  ;;  %v585_v1 = vadd.f32 1.0, %v895_v60 }
 0x107   :  { %v721_v2 = vmul.f32 -1.442695, %v504_v61 }
 0x108   :  { %v505_v3 = vadd.f32 %v1131_v29, %v445_v62  ;;  %v897_v4 = vpop.eup %896  ;;  %906 = vrcp.f32 %v585_v1 }
 0x109   :  { %645 = vst [vmem:[%s1222_s5 + $0x20] sm:$0xff] %v897_v4  ;;  %908 = vpow2.f32 %v721_v2  ;;  %v238_v7 = vpop.f32.mrb[24].mxu0 }
 0x10a   :  { %v722_v5 = vmul.f32 -1.442695, %v505_v3  ;;  %v899_v6 = vpop.eup %898  ;;  %v449_v8 = vpop.f32.mrb[24].mxu1 }
 0x10b   :  { %v901_v9 = vpop.eup %900  ;;  %646 = vst [vmem:[%s1222_s5 + $0x28] sm:$0xff] %v899_v6  ;;  %v450_v10 = vadd.f32 %v449_v8, %v238_v7  ;;  %v784_v11 = vpop.f32.mrb[25].mxu0 }
 0x10c   :  { %910 = vpow2.f32 %v722_v5  ;;  %v830_v12 = vpop.f32.mrb[25].mxu1  ;;  %v586_v13 = vadd.f32 1.0, %v901_v9  ;;  %v241_v14 = vpop.f32.mrb[26].mxu0 }
 0x10d   :  { %v452_v15 = vpop.f32.mrb[26].mxu1  ;;  %v506_v17 = vadd.f32 %v1131_v29, %v450_v10  ;;  %v785_v19 = vpop.f32.mrb[27].mxu0 }
 0x10e   :  { %v903_v16 = vpop.eup %902  ;;  %v453_v18 = vadd.f32 %v452_v15, %v241_v14  ;;  %v831_v20 = vpop.f32.mrb[27].mxu1  ;;  %912 = vrcp.f32 %v586_v13 }
 0x10f   :  { %v587_v21 = vadd.f32 1.0, %v903_v16  ;;  %v723_v22 = vmul.f32 -1.442695, %v506_v17 }
 0x110   :  { %v507_v23 = vadd.f32 %v1131_v29, %v453_v18  ;;  %v905_v24 = vpop.eup %904 }
 0x111   :  { %914 = vrcp.f32 %v587_v21  ;;  %647 = vst [vmem:[%s1222_s5 + $0x30] sm:$0xff] %v905_v24  ;;  %v246_v27 = vpop.f32.mrb[28].mxu0 }
 0x112   :  { %916 = vpow2.f32 %v723_v22  ;;  %v724_v25 = vmul.f32 -1.442695, %v507_v23  ;;  %v907_v26 = vpop.eup %906  ;;  %v457_v28 = vpop.f32.mrb[28].mxu1 }
 0x113   :  { %v909_v30 = vpop.eup %908  ;;  %648 = vst [vmem:[%s1222_s5 + $0x38] sm:$0xff] %v907_v26  ;;  %v458_v31 = vadd.f32 %v457_v28, %v246_v27  ;;  %v788_v32 = vpop.f32.mrb[29].mxu0 }
 0x114   :  { %918 = vpow2.f32 %v724_v25  ;;  %v834_v33 = vpop.f32.mrb[29].mxu1  ;;  %v588_v34 = vadd.f32 1.0, %v909_v30  ;;  %v249_v35 = vpop.f32.mrb[30].mxu0 }
 0x115   :  { %v460_v36 = vpop.f32.mrb[30].mxu1  ;;  %v508_v38 = vadd.f32 %v1131_v29, %v458_v31  ;;  %v789_v40 = vpop.f32.mrb[31].mxu0 }
 0x116   :  { %v911_v37 = vpop.eup %910  ;;  %v461_v39 = vadd.f32 %v460_v36, %v249_v35  ;;  %v835_v41 = vpop.f32.mrb[31].mxu1  ;;  %920 = vrcp.f32 %v588_v34 }
 0x117   :  { %v589_v42 = vadd.f32 1.0, %v911_v37  ;;  %v725_v43 = vmul.f32 -1.442695, %v508_v38 }
 0x118   :  { %v509_v44 = vadd.f32 %v1131_v29, %v461_v39  ;;  %v913_v45 = vpop.eup %912 }
 0x119   :  { %922 = vrcp.f32 %v589_v42  ;;  %649 = vst [vmem:[%s1222_s5 + $0x40] sm:$0xff] %v913_v45  ;;  %v254_v48 = vpop.f32.mrb[32].mxu0 }
 0x11a   :  { %924 = vpow2.f32 %v725_v43  ;;  %v726_v46 = vmul.f32 -1.442695, %v509_v44  ;;  %v465_v49 = vpop.f32.mrb[32].mxu1  ;;  %v792_v52 = vpop.f32.mrb[33].mxu0 }
 0x11b   :  { %v915_v47 = vpop.eup %914  ;;  %v466_v51 = vadd.f32 %v465_v49, %v254_v48  ;;  %v838_v53 = vpop.f32.mrb[33].mxu1 }
 0x11c   :  { %v917_v50 = vpop.eup %916  ;;  %650 = vst [vmem:[%s1222_s5 + $0x48] sm:$0xff] %v915_v47  ;;  %926 = vpow2.f32 %v726_v46  ;;  %v257_v55 = vpop.f32.mrb[34].mxu0 }
 0x11d   :  { %v590_v54 = vadd.f32 1.0, %v917_v50  ;;  %v468_v56 = vpop.f32.mrb[34].mxu1  ;;  %v510_v58 = vadd.f32 %v1131_v29, %v466_v51  ;;  %v793_v60 = vpop.f32.mrb[35].mxu0 }
 0x11e   :  { %v919_v57 = vpop.eup %918  ;;  %v469_v59 = vadd.f32 %v468_v56, %v257_v55  ;;  %v839_v61 = vpop.f32.mrb[35].mxu1 }
 0x11f   :  { %928 = vrcp.f32 %v590_v54  ;;  %v591_v62 = vadd.f32 1.0, %v919_v57  ;;  %v727_v63 = vmul.f32 -1.442695, %v510_v58 }
 0x120   :  { %v511_v0 = vadd.f32 %v1131_v29, %v469_v59  ;;  %v921_v1 = vpop.eup %920 }
 0x121   :  { %930 = vrcp.f32 %v591_v62  ;;  %651 = vst [vmem:[%s1222_s5 + $0x50] sm:$0xff] %v921_v1  ;;  %v262_v4 = vpop.f32.mrb[36].mxu0 }
 0x122   :  { %932 = vpow2.f32 %v727_v63  ;;  %v728_v2 = vmul.f32 -1.442695, %v511_v0  ;;  %v473_v5 = vpop.f32.mrb[36].mxu1  ;;  %v796_v8 = vpop.f32.mrb[37].mxu0 }
 0x123   :  { %v923_v3 = vpop.eup %922  ;;  %v474_v7 = vadd.f32 %v473_v5, %v262_v4  ;;  %v842_v9 = vpop.f32.mrb[37].mxu1 }
 0x124   :  { %v925_v6 = vpop.eup %924  ;;  %652 = vst [vmem:[%s1222_s5 + $0x58] sm:$0xff] %v923_v3  ;;  %934 = vpow2.f32 %v728_v2  ;;  %v265_v11 = vpop.f32.mrb[38].mxu0 }
 0x125   :  { %v592_v10 = vadd.f32 1.0, %v925_v6  ;;  %v476_v12 = vpop.f32.mrb[38].mxu1  ;;  %v512_v14 = vadd.f32 %v1131_v29, %v474_v7  ;;  %v797_v16 = vpop.f32.mrb[39].mxu0 }
 0x126   :  { %v927_v13 = vpop.eup %926  ;;  %v477_v15 = vadd.f32 %v476_v12, %v265_v11  ;;  %v843_v17 = vpop.f32.mrb[39].mxu1 }
 0x127   :  { %936 = vrcp.f32 %v592_v10  ;;  %v593_v18 = vadd.f32 1.0, %v927_v13  ;;  %v729_v19 = vmul.f32 -1.442695, %v512_v14 }
 0x128   :  { %v513_v20 = vadd.f32 %v1131_v29, %v477_v15 }
 0x129   :  { %v929_v21 = vpop.eup %928  ;;  %938 = vrcp.f32 %v593_v18  ;;  %v270_v24 = vpop.f32.mrb[40].mxu0 }
 0x12a   :  { %653 = vst [vmem:[%s1222_s5 + $0x60] sm:$0xff] %v929_v21  ;;  %940 = vpow2.f32 %v729_v19  ;;  %v730_v22 = vmul.f32 -1.442695, %v513_v20  ;;  %v481_v25 = vpop.f32.mrb[40].mxu1  ;;  %v800_v28 = vpop.f32.mrb[41].mxu0 }
 0x12b   :  { %v931_v23 = vpop.eup %930  ;;  %v482_v27 = vadd.f32 %v481_v25, %v270_v24  ;;  %v846_v30 = vpop.f32.mrb[41].mxu1 }
 0x12c   :  { %v933_v26 = vpop.eup %932  ;;  %654 = vst [vmem:[%s1222_s5 + $0x68] sm:$0xff] %v931_v23  ;;  %942 = vpow2.f32 %v730_v22  ;;  %v273_v32 = vpop.f32.mrb[42].mxu0 }
 0x12d   :  { %v594_v31 = vadd.f32 1.0, %v933_v26  ;;  %v484_v33 = vpop.f32.mrb[42].mxu1  ;;  %v514_v35 = vadd.f32 %v1131_v29, %v482_v27  ;;  %v801_v36 = vpop.f32.mrb[43].mxu0 }
 0x12e   :  { %v935_v34 = vpop.eup %934  ;;  %v847_v37 = vpop.f32.mrb[43].mxu1 }
 0x12f   :  { %944 = vrcp.f32 %v594_v31  ;;  %v595_v38 = vadd.f32 1.0, %v935_v34  ;;  %v731_v39 = vmul.f32 -1.442695, %v514_v35 }
 0x131   :  { %v937_v40 = vpop.eup %936  ;;  %946 = vrcp.f32 %v595_v38 }
 0x132   :  { %655 = vst [vmem:[%s1222_s5 + $0x70] sm:$0xff] %v937_v40  ;;  %948 = vpow2.f32 %v731_v39 }
 0x133   :  { %v939_v41 = vpop.eup %938 }
 0x134   :  { %v941_v42 = vpop.eup %940  ;;  %656 = vst [vmem:[%s1222_s5 + $0x78] sm:$0xff] %v939_v41 }
 0x135   :  { %v596_v43 = vadd.f32 1.0, %v941_v42 }
 0x136   :  { %v943_v29 = vpop.eup %942 }
 0x137   :  { %950 = vrcp.f32 %v596_v43  ;;  %v597_v44 = vadd.f32 1.0, %v943_v29 }
 0x139   :  { %v945_v45 = vpop.eup %944  ;;  %952 = vrcp.f32 %v597_v44 }
 0x13a   :  { %657 = vst [vmem:[%s1222_s5 + $0x80] sm:$0xff] %v945_v45 }
 0x13b   :  { %v947_v46 = vpop.eup %946 }
 0x13c   :  { %v949_v47 = vpop.eup %948  ;;  %658 = vst [vmem:[%s1222_s5 + $0x88] sm:$0xff] %v947_v46 }
 0x13d   :  { %v598_v48 = vadd.f32 1.0, %v949_v47 }
 0x13f   :  { %954 = vrcp.f32 %v598_v48 }
 0x141   :  { %v951_v49 = vpop.eup %950 }
 0x142   :  { %659 = vst [vmem:[%s1222_s5 + $0x90] sm:$0xff] %v951_v49 }
 0x143   :  { %v953_v50 = vpop.eup %952 }
 0x144   :  { %660 = vst [vmem:[%s1222_s5 + $0x98] sm:$0xff] %v953_v50 }
 0x149   :  { %v955_v51 = vpop.eup %954 }
 0x14a   :  { %661 = vst [vmem:[%s1222_s5 + $0xa0] sm:$0xff] %v955_v51 }

</bundles_post_ra>
